<compile_context>
chip_gen: v7x
topology: tpu7x:2x2x1
jax: 0.10.0
libtpu: 0.0.40
codegen_flags: <defaults>
</compile_context>

<pallas_src>
import jax
import jax.numpy as jnp
from jax.experimental import pallas as pl
from jax.experimental.pallas import tpu as pltpu

D1, D2 = 512, 256                    # hidden sizes fixed by the module
OUT_LANES = 128                      # lane-dense output block width
_W1_RESIDENT_MAX_BYTES = 12 << 20    # single W1 copy (pipeline allocates 2x)


def _round_up(x, m):
    return (x + m - 1) // m * m


def _leaky_relu_02(x):
    return jnp.where(x > 0, x, 0.2 * x)


def _head(h1_pre, b1, w2_bf, b2, w3_row, b3, out_shape):
    """Layers 2, 3 and the sigmoid, applied to a (TB, 512) f32 pre-activation."""
    h1 = _leaky_relu_02(h1_pre + b1)                                  # (TB, 512)
    h2 = jnp.dot(h1.astype(jnp.bfloat16), w2_bf,
                 preferred_element_type=jnp.float32)                  # MXU (bf16)
    h2 = _leaky_relu_02(h2 + b2)                                      # (TB, 256)
    # Linear(256, 1): VPU multiply + XLU lane reduce instead of an N=1 MXU dot.
    logits = jnp.sum(h2 * w3_row, axis=-1, keepdims=True) + b3
    sig = pl.reciprocal(1.0 + jnp.exp(-logits), approx=True)          # EUP exp+rcp
    # Lane-dense store: broadcast across 128 lanes; wrapper slices [:, :1].
    return jnp.broadcast_to(sig, out_shape)


def _kernel_resident(x_ref, w1_ref, b1_ref, w2_ref, b2_ref, w3_ref, b3_ref,
                     o_ref):
    """grid = (batch_tiles,).  W1 is VMEM-resident; one full-F MXU matmul."""
    x_bf = x_ref[...].astype(jnp.bfloat16)        # in-kernel cast, hides under MXU
    h1_pre = jnp.dot(x_bf, w1_ref[...], preferred_element_type=jnp.float32)
    o_ref[...] = _head(h1_pre, b1_ref[...], w2_ref[...], b2_ref[...],
                       w3_ref[...], b3_ref[0, 0], o_ref.shape)


def _kernel_streamed(x_ref, w1_ref, b1_ref, w2_ref, b2_ref, w3_ref, b3_ref,
                     o_ref, acc_ref):
    """grid = (batch_tiles, k_tiles).  Fallback for very large F (streamed W1)."""
    k = pl.program_id(1)

    @pl.when(k == 0)
    def _():
        acc_ref[...] = jnp.zeros_like(acc_ref)

    acc_ref[...] += jnp.dot(x_ref[...].astype(jnp.bfloat16), w1_ref[...],
                            preferred_element_type=jnp.float32)

    @pl.when(k == pl.num_programs(1) - 1)
    def _():
        o_ref[...] = _head(acc_ref[...], b1_ref[...], w2_ref[...], b2_ref[...],
                           w3_ref[...], b3_ref[0, 0], o_ref.shape)


def _vmem_limit_bytes(tb, tile_k, *, streamed):
    """Actual resident footprint (pipeline double-buffers every operand)."""
    footprint = (
        2 * tb * tile_k * 4          # x tiles, f32, double-buffered
        + 2 * tile_k * D1 * 2        # W1 tiles, bf16 (2 buffers even if resident)
        + 2 * D1 * D2 * 2            # W2, bf16
        + 2 * (D1 + 2 * D2) * 4      # b1, b2, W3 row (f32)
        + 2 * tb * OUT_LANES * 4     # output tiles
    )
    if streamed:
        footprint += tb * D1 * 4     # f32 layer-1 accumulator scratch
    return int(min(max(footprint + (4 << 20), 8 << 20), 48 << 20))


def prepare_params(params):
    """One-time weight prep (call OUTSIDE the training step and cache it).

    Returns: W1 (round_up(F,128), 512) bf16, W2 (512, 256) bf16,
             b1 (1,512) f32, b2 (1,256) f32, W3 (1,256) f32, b3 (1,1) f32.
    """
    w1 = jnp.asarray(params["W1"], jnp.float32)
    f = w1.shape[0]
    f_pad = _round_up(f, 128)
    if f_pad != f:
        w1 = jnp.pad(w1, ((0, f_pad - f), (0, 0)))     # zero feature cols: inert
    return {
        "W1": w1.astype(jnp.bfloat16),
        "b1": jnp.asarray(params["b1"], jnp.float32).reshape(1, D1),
        "W2": jnp.asarray(params["W2"], jnp.float32).astype(jnp.bfloat16),
        "b2": jnp.asarray(params["b2"], jnp.float32).reshape(1, D2),
        "W3": jnp.asarray(params["W3"], jnp.float32).reshape(1, D2),
        "b3": jnp.asarray(params["b3"], jnp.float32).reshape(1, 1),
    }


def discriminator_forward(img, prepared, *, tb=256, tk=512):
    """img: (B, C, H, W) float32.  `prepared` = prepare_params(raw_params)."""
    B = img.shape[0]
    x = img.reshape(B, -1).astype(jnp.float32)     # row-major flatten == .view
    F = x.shape[1]
    F128 = _round_up(F, 128)

    w1_bf = prepared["W1"]
    assert w1_bf.shape == (F128, D1) and w1_bf.dtype == jnp.bfloat16, \
        "pass the output of prepare_params(params)"

    # ---- tiling --------------------------------------------------------------
    resident = (F128 * D1 * 2) <= _W1_RESIDENT_MAX_BYTES
    B16 = _round_up(B, 16)                         # bf16 packs 16 rows per vreg
    if resident:
        F_pad, TK = F128, F128
        TB = min(tb, B16)
        if B16 >= 64:                              # v7x: >=2 blocks on the
            TB = min(TB, _round_up(B16 // 2, 16))  # "parallel" axis -> both TCs
        # keep the double-buffered f32 x tile modest when F is large
        TB = min(TB, max(16, ((8 << 20) // (2 * 4 * F_pad)) // 16 * 16))
    else:
        TK = max(128, (tk // 128) * 128)
        F_pad = _round_up(F, TK)
        # streamed W1: TB >= 768 keeps layer 1 MXU-bound (v6e ridge ~717 fl/B)
        TB = min(max(tb, 768), B16)
    TB = max(16, (TB // 16) * 16)
    B_pad = _round_up(B, TB)

    # ---- padding (zero rows/cols are inert) ----------------------------------
    if (B_pad, F_pad) != (B, F):
        x = jnp.pad(x, ((0, B_pad - B), (0, F_pad - F)))
    if F_pad != F128:                              # streamed path may pad further
        w1_bf = jnp.pad(w1_bf, ((0, F_pad - F128), (0, 0)))

    b1, w2_bf, b2 = prepared["b1"], prepared["W2"], prepared["b2"]
    w3_row, b3 = prepared["W3"], prepared["b3"]

    if resident:
        out = pl.pallas_call(
            _kernel_resident,
            out_shape=jax.ShapeDtypeStruct((B_pad, OUT_LANES), jnp.float32),
            grid_spec=pltpu.PrefetchScalarGridSpec(
                num_scalar_prefetch=0,
                grid=(B_pad // TB,),
                in_specs=[
                    pl.BlockSpec((TB, F_pad), lambda i: (i, 0)),        # x (f32, streamed)
                    pl.BlockSpec((F_pad, D1), lambda i: (0, 0)),        # W1 (resident)
                    pl.BlockSpec((1, D1), lambda i: (0, 0)),            # b1
                    pl.BlockSpec((D1, D2), lambda i: (0, 0)),           # W2 (resident)
                    pl.BlockSpec((1, D2), lambda i: (0, 0)),            # b2
                    pl.BlockSpec((1, D2), lambda i: (0, 0)),            # W3 row
                    pl.BlockSpec(memory_space=pltpu.MemorySpace.SMEM),  # b3 scalar
                ],
                out_specs=pl.BlockSpec((TB, OUT_LANES), lambda i: (i, 0)),
            ),
            compiler_params=pltpu.CompilerParams(
                dimension_semantics=("parallel",),
                vmem_limit_bytes=_vmem_limit_bytes(TB, F_pad, streamed=False),
            ),
        )(x, w1_bf, b1, w2_bf, b2, w3_row, b3)
    else:
        out = pl.pallas_call(
            _kernel_streamed,
            out_shape=jax.ShapeDtypeStruct((B_pad, OUT_LANES), jnp.float32),
            grid_spec=pltpu.PrefetchScalarGridSpec(
                num_scalar_prefetch=0,
                grid=(B_pad // TB, F_pad // TK),
                in_specs=[
                    pl.BlockSpec((TB, TK), lambda i, k: (i, k)),        # x (f32, streamed)
                    pl.BlockSpec((TK, D1), lambda i, k: (k, 0)),        # W1 (K-tiled)
                    pl.BlockSpec((1, D1), lambda i, k: (0, 0)),         # b1
                    pl.BlockSpec((D1, D2), lambda i, k: (0, 0)),        # W2 (resident)
                    pl.BlockSpec((1, D2), lambda i, k: (0, 0)),         # b2
                    pl.BlockSpec((1, D2), lambda i, k: (0, 0)),         # W3 row
                    pl.BlockSpec(memory_space=pltpu.MemorySpace.SMEM),  # b3 scalar
                ],
                out_specs=pl.BlockSpec((TB, OUT_LANES), lambda i, k: (i, 0)),
                scratch_shapes=[pltpu.VMEM((TB, D1), jnp.float32)],     # layer-1 acc
            ),
            compiler_params=pltpu.CompilerParams(
                dimension_semantics=("parallel", "arbitrary"),
                vmem_limit_bytes=_vmem_limit_bytes(TB, TK, streamed=True),
            ),
        )(x, w1_bf, b1, w2_bf, b2, w3_row, b3)

    return out[:B, :1]                             # (B, 1) like the PyTorch module


def init_params(key, in_features):
    """Deterministic init mirroring nn.Linear default: U(-1/sqrt(fan_in), +)."""
    dims = [(in_features, D1), (D1, D2), (D2, 1)]
    params = {}
    for i, (fan_in, fan_out) in enumerate(dims, start=1):
        key, kw, kb = jax.random.split(key, 3)
        bound = 1.0 / (fan_in ** 0.5)
        params[f"W{i}"] = jax.random.uniform(
            kw, (fan_in, fan_out), jnp.float32, -bound, bound)
        params[f"b{i}"] = jax.random.uniform(
            kb, (1, fan_out), jnp.float32, -bound, bound)
    return params


if __name__ == "__main__":
    key = jax.random.PRNGKey(0)
    k_img, k_par = jax.random.split(key)

    # Small image consistent with make_model(img_shape=(C, H, W)).
    B, C, H, W = 2, 4, 16, 16                      # prod(img_shape) = 1024
    img = jax.random.normal(k_img, (B, C, H, W), jnp.float32)
    params = init_params(k_par, C * H * W)

    prepared = prepare_params(params)              # one-time weight cast / pad
    validity = discriminator_forward(img, prepared)
    validity = jax.block_until_ready(validity)

    # Pure-JAX reference using the SAME bf16-inputs / f32-accumulate math.
    x_flat = img.reshape(B, -1)
    h1 = _leaky_relu_02(
        jnp.dot(x_flat.astype(jnp.bfloat16), params["W1"].astype(jnp.bfloat16),
                preferred_element_type=jnp.float32) + params["b1"])
    h2 = _leaky_relu_02(
        jnp.dot(h1.astype(jnp.bfloat16), params["W2"].astype(jnp.bfloat16),
                preferred_element_type=jnp.float32) + params["b2"])
    ref = jax.nn.sigmoid(h2 @ params["W3"] + params["b3"])

    assert validity.shape == (B, 1), validity.shape
    assert jnp.allclose(validity, ref, atol=5e-3, rtol=5e-3), (validity, ref)

    print("KERNEL_OK")
</pallas_src>

<mosaic_0001>
module attributes {stable_mosaic.version = 11 : i64} {
  func.func @_kernel_resident(%arg0: i32, %arg1: memref<16x1024xf32, #tpu.memory_space<vmem>>, %arg2: memref<1024x512xbf16, #tpu.memory_space<vmem>>, %arg3: memref<1x512xf32, #tpu.memory_space<vmem>>, %arg4: memref<512x256xbf16, #tpu.memory_space<vmem>>, %arg5: memref<1x256xf32, #tpu.memory_space<vmem>>, %arg6: memref<1x256xf32, #tpu.memory_space<vmem>>, %arg7: memref<1x1xf32, #tpu.memory_space<smem>>, %arg8: memref<16x128xf32, #tpu.memory_space<vmem>>) attributes {dimension_semantics = [#tpu.dimension_semantics<parallel>], iteration_bounds = array<i64: 1>, scalar_prefetch = 0 : i64, scratch_operands = 0 : i64, tpu.core_type = #tpu.core_type<tc>, window_params = [{transform_indices = @transform_0, window_bounds = array<i64: 16, 1024>}, {pipeline_mode = #tpu.pipeline_mode<synchronous>, transform_indices = @transform_1, window_bounds = array<i64: 1024, 512>}, {pipeline_mode = #tpu.pipeline_mode<synchronous>, transform_indices = @transform_2, window_bounds = array<i64: 1, 512>}, {pipeline_mode = #tpu.pipeline_mode<synchronous>, transform_indices = @transform_3, window_bounds = array<i64: 512, 256>}, {pipeline_mode = #tpu.pipeline_mode<synchronous>, transform_indices = @transform_4, window_bounds = array<i64: 1, 256>}, {pipeline_mode = #tpu.pipeline_mode<synchronous>, transform_indices = @transform_5, window_bounds = array<i64: 1, 256>}, {transform_indices = @transform_6, window_bounds = array<i64: 1, 1>}, {transform_indices = @transform_7, window_bounds = array<i64: 16, 128>}]} {
    %c0 = arith.constant 0 : index
    %c0_0 = arith.constant 0 : index
    %0 = vector.load %arg1[%c0, %c0_0] : memref<16x1024xf32, #tpu.memory_space<vmem>>, vector<16x1024xf32>
    %1 = arith.truncf %0 : vector<16x1024xf32> to vector<16x1024xbf16>
    %c0_1 = arith.constant 0 : index
    %c0_2 = arith.constant 0 : index
    %2 = vector.load %arg2[%c0_1, %c0_2] : memref<1024x512xbf16, #tpu.memory_space<vmem>>, vector<1024x512xbf16>
    %cst = arith.constant dense<0.000000e+00> : vector<16x512xf32>
    %3 = tpu.matmul %1, %2, %cst {dimension_numbers = #tpu.dot_dimension_numbers<[1], [0], [0], [1], [0, 0, 1, 1], [], []>} : vector<16x1024xbf16>, vector<1024x512xbf16>, vector<16x512xf32> -> vector<16x512xf32>
    %c0_3 = arith.constant 0 : index
    %c0_4 = arith.constant 0 : index
    %4 = vector.load %arg3[%c0_3, %c0_4] : memref<1x512xf32, #tpu.memory_space<vmem>>, vector<1x512xf32>
    %c0_5 = arith.constant 0 : index
    %c0_6 = arith.constant 0 : index
    %5 = vector.load %arg4[%c0_5, %c0_6] : memref<512x256xbf16, #tpu.memory_space<vmem>>, vector<512x256xbf16>
    %c0_7 = arith.constant 0 : index
    %c0_8 = arith.constant 0 : index
    %6 = vector.load %arg5[%c0_7, %c0_8] : memref<1x256xf32, #tpu.memory_space<vmem>>, vector<1x256xf32>
    %c0_9 = arith.constant 0 : index
    %c0_10 = arith.constant 0 : index
    %7 = vector.load %arg6[%c0_9, %c0_10] : memref<1x256xf32, #tpu.memory_space<vmem>>, vector<1x256xf32>
    %c0_11 = arith.constant 0 : index
    %c0_12 = arith.constant 0 : index
    %8 = memref.load %arg7[%c0_11, %c0_12] : memref<1x1xf32, #tpu.memory_space<smem>>
    %9 = vector.broadcast %4 : vector<1x512xf32> to vector<16x512xf32>
    %10 = arith.addf %3, %9 : vector<16x512xf32>
    %cst_13 = arith.constant 0.000000e+00 : f32
    %11 = vector.broadcast %cst_13 : f32 to vector<16x512xf32>
    %12 = arith.cmpf ogt, %10, %11 : vector<16x512xf32>
    %cst_14 = arith.constant 2.000000e-01 : f32
    %13 = vector.broadcast %cst_14 : f32 to vector<16x512xf32>
    %14 = arith.mulf %13, %10 : vector<16x512xf32>
    %15 = arith.select %12, %10, %14 : vector<16x512xi1>, vector<16x512xf32>
    %16 = arith.truncf %15 : vector<16x512xf32> to vector<16x512xbf16>
    %cst_15 = arith.constant dense<0.000000e+00> : vector<16x256xf32>
    %17 = tpu.matmul %16, %5, %cst_15 {dimension_numbers = #tpu.dot_dimension_numbers<[1], [0], [0], [1], [0, 0, 1, 1], [], []>} : vector<16x512xbf16>, vector<512x256xbf16>, vector<16x256xf32> -> vector<16x256xf32>
    %18 = vector.broadcast %6 : vector<1x256xf32> to vector<16x256xf32>
    %19 = arith.addf %17, %18 : vector<16x256xf32>
    %cst_16 = arith.constant 0.000000e+00 : f32
    %20 = vector.broadcast %cst_16 : f32 to vector<16x256xf32>
    %21 = arith.cmpf ogt, %19, %20 : vector<16x256xf32>
    %cst_17 = arith.constant 2.000000e-01 : f32
    %22 = vector.broadcast %cst_17 : f32 to vector<16x256xf32>
    %23 = arith.mulf %22, %19 : vector<16x256xf32>
    %24 = arith.select %21, %19, %23 : vector<16x256xi1>, vector<16x256xf32>
    %25 = vector.broadcast %7 : vector<1x256xf32> to vector<16x256xf32>
    %26 = arith.mulf %24, %25 : vector<16x256xf32>
    %cst_18 = arith.constant dense<0.000000e+00> : vector<16xf32>
    %27 = vector.multi_reduction <add>, %26, %cst_18 [1] : vector<16x256xf32> to vector<16xf32>
    %28 = vector.shape_cast %27 : vector<16xf32> to vector<16x1xf32>
    %29 = vector.broadcast %8 : f32 to vector<16x1xf32>
    %30 = arith.addf %28, %29 : vector<16x1xf32>
    %cst_19 = arith.constant 0.000000e+00 : f32
    %31 = vector.broadcast %cst_19 : f32 to vector<16x1xf32>
    %32 = arith.subf %31, %30 : vector<16x1xf32>
    %33 = math.exp %32 : vector<16x1xf32>
    %cst_20 = arith.constant 1.000000e+00 : f32
    %34 = vector.broadcast %cst_20 : f32 to vector<16x1xf32>
    %35 = arith.addf %34, %33 : vector<16x1xf32>
    %36 = tpu.reciprocal %35 {approx = true} : vector<16x1xf32> -> vector<16x1xf32>
    %37 = vector.shape_cast %36 : vector<16x1xf32> to vector<16x1xf32>
    %38 = vector.broadcast %37 : vector<16x1xf32> to vector<16x128xf32>
    %c0_21 = arith.constant 0 : index
    %c0_22 = arith.constant 0 : index
    %39 = vector.load %arg8[%c0_21, %c0_22] : memref<16x128xf32, #tpu.memory_space<vmem>>, vector<16x128xf32>
    tpu.vector_store %arg8[%c0_21, %c0_22], %38 {strides = array<i32>} : memref<16x128xf32, #tpu.memory_space<vmem>>, vector<16x128xf32>,
    return
  }
  func.func @transform_0(%arg0: i32) -> (i32, i32) {
    %c0_i32 = arith.constant 0 : i32
    %c0_i32_0 = arith.constant 0 : i32
    return %arg0, %c0_i32 : i32, i32
  }
  func.func @transform_1(%arg0: i32) -> (i32, i32) {
    %c0_i32 = arith.constant 0 : i32
    %c0_i32_0 = arith.constant 0 : i32
    %c0_i32_1 = arith.constant 0 : i32
    return %c0_i32, %c0_i32_0 : i32, i32
  }
  func.func @transform_2(%arg0: i32) -> (i32, i32) {
    %c0_i32 = arith.constant 0 : i32
    %c0_i32_0 = arith.constant 0 : i32
    %c0_i32_1 = arith.constant 0 : i32
    return %c0_i32, %c0_i32_0 : i32, i32
  }
  func.func @transform_3(%arg0: i32) -> (i32, i32) {
    %c0_i32 = arith.constant 0 : i32
    %c0_i32_0 = arith.constant 0 : i32
    %c0_i32_1 = arith.constant 0 : i32
    return %c0_i32, %c0_i32_0 : i32, i32
  }
  func.func @transform_4(%arg0: i32) -> (i32, i32) {
    %c0_i32 = arith.constant 0 : i32
    %c0_i32_0 = arith.constant 0 : i32
    %c0_i32_1 = arith.constant 0 : i32
    return %c0_i32, %c0_i32_0 : i32, i32
  }
  func.func @transform_5(%arg0: i32) -> (i32, i32) {
    %c0_i32 = arith.constant 0 : i32
    %c0_i32_0 = arith.constant 0 : i32
    %c0_i32_1 = arith.constant 0 : i32
    return %c0_i32, %c0_i32_0 : i32, i32
  }
  func.func @transform_6(%arg0: i32) -> (i32, i32) {
    %c0_i32 = arith.constant 0 : i32
    %c0_i32_0 = arith.constant 0 : i32
    %c0_i32_1 = arith.constant 0 : i32
    return %c0_i32, %c0_i32_0 : i32, i32
  }
  func.func @transform_7(%arg0: i32) -> (i32, i32) {
    %c0_i32 = arith.constant 0 : i32
    %c0_i32_0 = arith.constant 0 : i32
    return %arg0, %c0_i32 : i32, i32
  }
}

</mosaic_0001>

<bundles_post_ra>
// kernel: tpu_custom_call.1
= control target key start
LH: loop header
LB: loop body
LE: loop exit
PB: predicated region body
PF: predicated region fallthrough
CT: control target
= control target key end

     0   :  { %13 = vsyncpa [#allocation4], 0  ;;  %s3704_s0 = inlined_call_operand.hbm [shape: f32[16,1024], index: 0, kind: input, shape index: {}]   ;;  %s3705_s1 = inlined_call_operand.hbm [shape: bf16[1024,512], index: 1, kind: input, shape index: {}]   ;;  %s3706_s2 = inlined_call_operand.vmem [shape: f32[1,512], index: 2, kind: input, shape index: {}]   ;;  %s3707_s3 = inlined_call_operand.hbm [shape: bf16[512,256], index: 3, kind: input, shape index: {}]   ;;  %s3708_s4 = inlined_call_operand.vmem [shape: f32[1,256], index: 4, kind: input, shape index: {}]   ;;  %s3709_s5 = inlined_call_operand.vmem [shape: f32[1,256], index: 5, kind: input, shape index: {}]   ;;  %s3710_s6 = inlined_call_operand.<no memory space> [shape: f32[1,1], index: 6, kind: input, shape index: {}]   ;;  %s3711_s7 = inlined_call_operand.hbm [shape: f32[16,128], index: 7, kind: output, shape index: {}]  }
   0x1   :  { %14 = vsyncpa [#allocation7], 0 }
   0x2   :  { %15 = vsyncpa [#allocation5], 0  ;;  %s3525_s24 = smov [#allocation6]   ;;  %s3431_s28 = scalar_lea.hbm %s3705_s1, 32768 }
   0x3   :  { %s33_s25 = sshll.u32 %s3525_s24, 4  ;;  %p3432_p0 = scmp.ne.s32.totalorder %s3705_s1, %s3431_s28  ;;  %s34_s25 = int_to_ptr.vmem [resolvable:$true] %s33_s25 }
   0x4   :  { %p3435_p1 = scmp.lt.u32.totalorder %s3431_s28, %s3705_s1 }
   0x6   :  { %p3437_p2 = pnand %p3435_p1, %p3432_p0 }
   0x8   :  { %3440 = shalt.err (!%p3437_p2)
}
   0x9   :  { %s3441_s10 = scalar_lea.vmem %s34_s25, 32768  ;;  %p3446_p4 = scmp.lt.s32.totalorder %s34_s25, %s34_s25 }
   0xa   :  { %p3442_p3 = scmp.ne.s32.totalorder %s34_s25, %s3441_s10  ;;  %p3447_p5 = scmp.lt.s32.totalorder %s3441_s10, %s3441_s10 }
   0xc   :  { %p3448_p6 = por %p3447_p5, %p3446_p4 }
   0xe   :  { %p3449_p7 = pnand %p3448_p6, %p3442_p3 }
  0x10   :  { %3452 = shalt.err (!%p3449_p7)
}
  0x11   :  { %s3526_s11 = smov 256   ;;  %s3527_s12 = smov 16  }
  0x12   :  { %39 = dma.hbm_to_vmem [thread:$0]  %s3705_s1, 32768, %s34_s25, [#allocation7], %s3526_s11, %s3526_s11, %s3527_s12  }
  0x13   :  { %s3528_s15 = smov [#allocation3]   ;;  %s3453_s19 = scalar_lea.hbm %s3704_s0, 2048 }
  0x14   :  { %s21_s16 = sshll.u32 %s3528_s15, 4  ;;  %p3454_p8 = scmp.ne.s32.totalorder %s3704_s0, %s3453_s19  ;;  %s22_s16 = int_to_ptr.vmem [resolvable:$true] %s21_s16 }
  0x15   :  { %p3457_p9 = scmp.lt.u32.totalorder %s3453_s19, %s3704_s0 }
  0x17   :  { %p3459_p10 = pnand %p3457_p9, %p3454_p8 }
  0x19   :  { %3462 = shalt.err (!%p3459_p10)
}
  0x1a   :  { %s3463_s24 = scalar_lea.vmem %s22_s16, 2048  ;;  %p3468_p12 = scmp.lt.s32.totalorder %s22_s16, %s22_s16 }
  0x1b   :  { %p3464_p11 = scmp.ne.s32.totalorder %s22_s16, %s3463_s24  ;;  %p3469_p13 = scmp.lt.s32.totalorder %s3463_s24, %s3463_s24 }
  0x1d   :  { %p3470_p0 = por %p3469_p13, %p3468_p12 }
  0x1f   :  { %p3471_p1 = pnand %p3470_p0, %p3464_p11 }
  0x21   :  { %3474 = shalt.err (!%p3471_p1)
}
  0x22   :  { %s3529_s1 = smov 1024   ;;  %s3530_s25 = smov 64  }
  0x23   :  { %27 = dma.hbm_to_vmem [thread:$0]  %s3704_s0, 2048, %s22_s16, [#allocation4], %s3529_s1, %s3529_s1, %s3530_s25  }
  0x24   :  { %s3531_s28 = smov [#allocation8]   ;;  %s3475_s9 = scalar_lea.hbm %s3707_s3, 8192 }
  0x25   :  { %s47_s29 = sshll.u32 %s3531_s28, 4  ;;  %p3476_p2 = scmp.ne.s32.totalorder %s3707_s3, %s3475_s9  ;;  %s48_s29 = int_to_ptr.vmem [resolvable:$true] %s47_s29 }
  0x26   :  { %p3479_p3 = scmp.lt.u32.totalorder %s3475_s9, %s3707_s3 }
  0x28   :  { %p3481_p4 = pnand %p3479_p3, %p3476_p2 }
  0x2a   :  { %3484 = shalt.err (!%p3481_p4)
}
  0x2b   :  { %s3485_s14 = scalar_lea.vmem %s48_s29, 8192  ;;  %p3490_p6 = scmp.lt.s32.totalorder %s48_s29, %s48_s29 }
  0x2c   :  { %p3486_p5 = scmp.ne.s32.totalorder %s48_s29, %s3485_s14  ;;  %p3491_p7 = scmp.lt.s32.totalorder %s3485_s14, %s3485_s14 }
  0x2e   :  { %p3492_p8 = por %p3491_p7, %p3490_p6 }
  0x30   :  { %p3493_p9 = pnand %p3492_p8, %p3486_p5 }
  0x32   :  { %3496 = shalt.err (!%p3493_p9)
}
  0x33   :  { %s3532_s0 = smov 128   ;;  %s3533_s15 = smov 8  }
  0x34   :  { %53 = dma.hbm_to_vmem [thread:$0]  %s3707_s3, 8192, %s48_s29, [#allocation7], %s3532_s0, %s3532_s0, %s3533_s15  }
  0x35   :  { %3519 = dma.done.wait [#allocation4], 2048  }
  0x36   :  { %3520 = vsyncadd [#allocation4], 4294965248 }
  0x37   :  { %3521 = dma.done.wait [#allocation7], 40960  }
  0x38   :  { %3522 = vsyncadd [#allocation7], 4294926336  ;;  %v2943_v0 = vld [vmem:[#allocation6 + $0x4] ss:$16 sps:$4 sm:$0xff]   ;;  %v2947_v2 = vld [vmem:[#allocation6] ss:$16 sps:$4 sm:$0xff]  }
  0x39   :  { %v2945_v1 = vld [vmem:[#allocation6 + $0x204] ss:$16 sps:$4 sm:$0xff]   ;;  %1718 = vmatprep.subr.bf16.mxu1 %v2943_v0  ;;  %v2948_v3 = vld [vmem:[#allocation6 + $0x200] ss:$16 sps:$4 sm:$0xff]   ;;  %v70_v46 = vld [vmem:[#allocation3 + $0x8] sm:$0xff]  ;;  %s3534_s22 = smov [#allocation9]  }
  0x3a   :  { %1761 = vmatprep.subr.bf16.mxu0 %v2945_v1  ;;  %v2949_v4 = vld [vmem:[#allocation6 + $0x24] ss:$16 sps:$4 sm:$0xff]   ;;  %1719 = vmatpush1.bf16.msra.mxu1 %v2947_v2  ;;  %v2953_v6 = vld [vmem:[#allocation6 + $0x20] ss:$16 sps:$4 sm:$0xff]   ;;  %v78_v49 = vld [vmem:[#allocation3 + $0x48] sm:$0xff]  ;;  %s2560_s23 = sshll.u32 %s3534_s22, 4  ;;  %s2561_s23 = int_to_ptr.vmem [resolvable:$true] %s2560_s23 }
  0x3b   :  { %1762 = vmatpush1.bf16.msra.mxu0 %v2948_v3  ;;  %v2951_v5 = vld [vmem:[#allocation6 + $0x224] ss:$16 sps:$4 sm:$0xff]   ;;  %1720 = vmatprep.subr.bf16.mxu1 %v2949_v4  ;;  %v2954_v7 = vld [vmem:[#allocation6 + $0x220] ss:$16 sps:$4 sm:$0xff]   ;;  %v3614_v50 = vpack.c.bf16 %v78_v49, %v70_v46  ;;  %v72_v51 = vld [vmem:[#allocation3 + $0x18] sm:$0xff]  ;;  %p3502_p11 = scmp.lt.s32.totalorder %s2561_s23, %s2561_s23 }
  0x3c   :  { %1763 = vmatprep.subr.bf16.mxu0 %v2951_v5  ;;  %v2955_v8 = vld [vmem:[#allocation6 + $0x44] ss:$16 sps:$4 sm:$0xff]   ;;  %v2959_v10 = vld [vmem:[#allocation6 + $0x40] ss:$16 sps:$4 sm:$0xff]   ;;  %v80_v52 = vld [vmem:[#allocation3 + $0x58] sm:$0xff] }
  0x3d   :  { %v2957_v9 = vld [vmem:[#allocation6 + $0x244] ss:$16 sps:$4 sm:$0xff]   ;;  %v2960_v11 = vld [vmem:[#allocation6 + $0x240] ss:$16 sps:$4 sm:$0xff]   ;;  %v3616_v55 = vpack.c.bf16 %v80_v52, %v72_v51  ;;  %1750 = vmatprep.mubr.bf16.mxu1 %v3614_v50  ;;  %v3084_v46 = vld [vmem:[#allocation6 + $0xe8] ss:$16 sps:$4 sm:$0xff]  }
  0x3e   :  { %1721 = vmatpush1.bf16.msra.mxu1 %v2953_v6  ;;  %v2961_v12 = vld [vmem:[#allocation6 + $0x64] ss:$16 sps:$4 sm:$0xff]   ;;  %v2965_v14 = vld [vmem:[#allocation6 + $0x60] ss:$16 sps:$4 sm:$0xff]   ;;  %v3098_v52 = vld [vmem:[#allocation6 + $0x12c] ss:$16 sps:$4 sm:$0xff]  }
  0x3f   :  { %1764 = vmatpush1.bf16.msra.mxu0 %v2954_v7  ;;  %1722 = vmatprep.subr.bf16.mxu1 %v2955_v8  ;;  %v2963_v13 = vld [vmem:[#allocation6 + $0x264] ss:$16 sps:$4 sm:$0xff]   ;;  %v2966_v15 = vld [vmem:[#allocation6 + $0x260] ss:$16 sps:$4 sm:$0xff]  }
  0x40   :  { %1765 = vmatprep.subr.bf16.mxu0 %v2957_v9  ;;  %v2967_v16 = vld [vmem:[#allocation6 + $0x84] ss:$16 sps:$4 sm:$0xff]   ;;  %v2971_v18 = vld [vmem:[#allocation6 + $0x80] ss:$16 sps:$4 sm:$0xff]   ;;  %1793 = vmatprep.mubr.bf16.mxu0 %v3616_v55 }
  0x41   :  { %v2969_v17 = vld [vmem:[#allocation6 + $0x284] ss:$16 sps:$4 sm:$0xff]   ;;  %v2972_v19 = vld [vmem:[#allocation6 + $0x280] ss:$16 sps:$4 sm:$0xff]  }
  0x42   :  { %1723 = vmatpush1.bf16.msra.mxu1 %v2959_v10  ;;  %v2973_v20 = vld [vmem:[#allocation6 + $0xa4] ss:$16 sps:$4 sm:$0xff]   ;;  %v2977_v22 = vld [vmem:[#allocation6 + $0xa0] ss:$16 sps:$4 sm:$0xff]  }
  0x43   :  { %1766 = vmatpush1.bf16.msra.mxu0 %v2960_v11  ;;  %1724 = vmatprep.subr.bf16.mxu1 %v2961_v12  ;;  %v2975_v21 = vld [vmem:[#allocation6 + $0x2a4] ss:$16 sps:$4 sm:$0xff]   ;;  %v2978_v23 = vld [vmem:[#allocation6 + $0x2a0] ss:$16 sps:$4 sm:$0xff]   ;;  %v3044_v11 = vld [vmem:[#allocation6 + $0xc] ss:$16 sps:$4 sm:$0xff]  }
  0x44   :  { %1767 = vmatprep.subr.bf16.mxu0 %v2963_v13  ;;  %v2979_v24 = vld [vmem:[#allocation6 + $0xc4] ss:$16 sps:$4 sm:$0xff]   ;;  %v2983_v26 = vld [vmem:[#allocation6 + $0xc0] ss:$16 sps:$4 sm:$0xff]  }
  0x45   :  { %v2981_v25 = vld [vmem:[#allocation6 + $0x2c4] ss:$16 sps:$4 sm:$0xff]   ;;  %v2984_v27 = vld [vmem:[#allocation6 + $0x2c0] ss:$16 sps:$4 sm:$0xff]  }
  0x46   :  { %1725 = vmatpush1.bf16.msra.mxu1 %v2965_v14  ;;  %v2985_v28 = vld [vmem:[#allocation6 + $0xe4] ss:$16 sps:$4 sm:$0xff]   ;;  %v2989_v30 = vld [vmem:[#allocation6 + $0xe0] ss:$16 sps:$4 sm:$0xff]   ;;  %v3042_v14 = vld [vmem:[#allocation6 + $0x8] ss:$16 sps:$4 sm:$0xff]  }
  0x47   :  { %1768 = vmatpush1.bf16.msra.mxu0 %v2966_v15  ;;  %1726 = vmatprep.subr.bf16.mxu1 %v2967_v16  ;;  %v2987_v29 = vld [vmem:[#allocation6 + $0x2e4] ss:$16 sps:$4 sm:$0xff]   ;;  %v2990_v31 = vld [vmem:[#allocation6 + $0x2e0] ss:$16 sps:$4 sm:$0xff]  }
  0x48   :  { %1769 = vmatprep.subr.bf16.mxu0 %v2969_v17  ;;  %v2991_v32 = vld [vmem:[#allocation6 + $0x104] ss:$16 sps:$4 sm:$0xff]   ;;  %v2995_v34 = vld [vmem:[#allocation6 + $0x100] ss:$16 sps:$4 sm:$0xff]   ;;  %v3050_v17 = vld [vmem:[#allocation6 + $0x2c] ss:$16 sps:$4 sm:$0xff]  }
  0x49   :  { %v2993_v33 = vld [vmem:[#allocation6 + $0x304] ss:$16 sps:$4 sm:$0xff]   ;;  %v2996_v35 = vld [vmem:[#allocation6 + $0x300] ss:$16 sps:$4 sm:$0xff]  }
  0x4a   :  { %1727 = vmatpush1.bf16.msra.mxu1 %v2971_v18  ;;  %v2997_v36 = vld [vmem:[#allocation6 + $0x124] ss:$16 sps:$4 sm:$0xff]   ;;  %v3001_v38 = vld [vmem:[#allocation6 + $0x120] ss:$16 sps:$4 sm:$0xff]  }
  0x4b   :  { %1770 = vmatpush1.bf16.msra.mxu0 %v2972_v19  ;;  %1728 = vmatprep.subr.bf16.mxu1 %v2973_v20  ;;  %v2999_v37 = vld [vmem:[#allocation6 + $0x324] ss:$16 sps:$4 sm:$0xff]   ;;  %v3002_v39 = vld [vmem:[#allocation6 + $0x320] ss:$16 sps:$4 sm:$0xff]   ;;  %v3048_v19 = vld [vmem:[#allocation6 + $0x28] ss:$16 sps:$4 sm:$0xff]  }
  0x4c   :  { %1771 = vmatprep.subr.bf16.mxu0 %v2975_v21  ;;  %v3003_v40 = vld [vmem:[#allocation6 + $0x144] ss:$16 sps:$4 sm:$0xff]   ;;  %v3007_v42 = vld [vmem:[#allocation6 + $0x140] ss:$16 sps:$4 sm:$0xff]   ;;  %v3056_v21 = vld [vmem:[#allocation6 + $0x4c] ss:$16 sps:$4 sm:$0xff]  }
  0x4d   :  { %v3005_v41 = vld [vmem:[#allocation6 + $0x344] ss:$16 sps:$4 sm:$0xff]   ;;  %v3008_v43 = vld [vmem:[#allocation6 + $0x340] ss:$16 sps:$4 sm:$0xff]  }
  0x4e   :  { %1729 = vmatpush1.bf16.msra.mxu1 %v2977_v22  ;;  %v3009_v44 = vld [vmem:[#allocation6 + $0x164] ss:$16 sps:$4 sm:$0xff]   ;;  %v3013_v47 = vld [vmem:[#allocation6 + $0x160] ss:$16 sps:$4 sm:$0xff]  }
  0x4f   :  { %1772 = vmatpush1.bf16.msra.mxu0 %v2978_v23  ;;  %1730 = vmatprep.subr.bf16.mxu1 %v2979_v24  ;;  %v3011_v45 = vld [vmem:[#allocation6 + $0x364] ss:$16 sps:$4 sm:$0xff]   ;;  %v3014_v48 = vld [vmem:[#allocation6 + $0x360] ss:$16 sps:$4 sm:$0xff]   ;;  %v3054_v23 = vld [vmem:[#allocation6 + $0x48] ss:$16 sps:$4 sm:$0xff]  }
  0x50   :  { %1773 = vmatprep.subr.bf16.mxu0 %v2981_v25  ;;  %v3015_v53 = vld [vmem:[#allocation6 + $0x184] ss:$16 sps:$4 sm:$0xff]   ;;  %v3019_v56 = vld [vmem:[#allocation6 + $0x180] ss:$16 sps:$4 sm:$0xff]   ;;  %v3062_v25 = vld [vmem:[#allocation6 + $0x6c] ss:$16 sps:$4 sm:$0xff]  }
  0x51   :  { %v3017_v54 = vld [vmem:[#allocation6 + $0x384] ss:$16 sps:$4 sm:$0xff]   ;;  %v3020_v57 = vld [vmem:[#allocation6 + $0x380] ss:$16 sps:$4 sm:$0xff]  }
  0x52   :  { %1731 = vmatpush1.bf16.msra.mxu1 %v2983_v26  ;;  %v3021_v58 = vld [vmem:[#allocation6 + $0x1a4] ss:$16 sps:$4 sm:$0xff]   ;;  %v3025_v60 = vld [vmem:[#allocation6 + $0x1a0] ss:$16 sps:$4 sm:$0xff]  }
  0x53   :  { %1774 = vmatpush1.bf16.msra.mxu0 %v2984_v27  ;;  %1732 = vmatprep.subr.bf16.mxu1 %v2985_v28  ;;  %v3023_v59 = vld [vmem:[#allocation6 + $0x3a4] ss:$16 sps:$4 sm:$0xff]   ;;  %v3026_v61 = vld [vmem:[#allocation6 + $0x3a0] ss:$16 sps:$4 sm:$0xff]   ;;  %v3060_v27 = vld [vmem:[#allocation6 + $0x68] ss:$16 sps:$4 sm:$0xff]  }
  0x54   :  { %1775 = vmatprep.subr.bf16.mxu0 %v2987_v29  ;;  %v3027_v62 = vld [vmem:[#allocation6 + $0x1c4] ss:$16 sps:$4 sm:$0xff]   ;;  %v3031_v0 = vld [vmem:[#allocation6 + $0x1c0] ss:$16 sps:$4 sm:$0xff]   ;;  %v3068_v29 = vld [vmem:[#allocation6 + $0x8c] ss:$16 sps:$4 sm:$0xff]  }
  0x55   :  { %v3029_v63 = vld [vmem:[#allocation6 + $0x3c4] ss:$16 sps:$4 sm:$0xff]   ;;  %v3032_v1 = vld [vmem:[#allocation6 + $0x3c0] ss:$16 sps:$4 sm:$0xff]  }
  0x56   :  { %1733 = vmatpush1.bf16.msra.mxu1 %v2989_v30  ;;  %v3033_v2 = vld [vmem:[#allocation6 + $0x1e4] ss:$16 sps:$4 sm:$0xff]   ;;  %v3037_v4 = vld [vmem:[#allocation6 + $0x1e0] ss:$16 sps:$4 sm:$0xff]  }
  0x57   :  { %1776 = vmatpush1.bf16.msra.mxu0 %v2990_v31  ;;  %1734 = vmatprep.subr.bf16.mxu1 %v2991_v32  ;;  %v3035_v3 = vld [vmem:[#allocation6 + $0x3e4] ss:$16 sps:$4 sm:$0xff]   ;;  %v3038_v5 = vld [vmem:[#allocation6 + $0x3e0] ss:$16 sps:$4 sm:$0xff]   ;;  %v3066_v31 = vld [vmem:[#allocation6 + $0x88] ss:$16 sps:$4 sm:$0xff]  }
  0x58   :  { %1777 = vmatprep.subr.bf16.mxu0 %v2993_v33  ;;  %v69_v6 = vld [vmem:[#allocation3] sm:$0xff]  ;;  %v71_v9 = vld [vmem:[#allocation3 + $0x10] sm:$0xff]  ;;  %v3074_v33 = vld [vmem:[#allocation6 + $0xac] ss:$16 sps:$4 sm:$0xff]  }
  0x59   :  { %v77_v7 = vld [vmem:[#allocation3 + $0x40] sm:$0xff]  ;;  %v79_v10 = vld [vmem:[#allocation3 + $0x50] sm:$0xff] }
  0x5a   :  { %1735 = vmatpush1.bf16.msra.mxu1 %v2995_v34  ;;  %v3041_v8 = vld [vmem:[#allocation6 + $0x404] ss:$16 sps:$4 sm:$0xff]   ;;  %v3620_v12 = vpack.c.bf16 %v77_v7, %v69_v6  ;;  %v3039_v13 = vld [vmem:[#allocation6 + $0x400] ss:$16 sps:$4 sm:$0xff]   ;;  %v3622_v15 = vpack.c.bf16 %v79_v10, %v71_v9  ;;  %v3120_v7 = vld [vmem:[#allocation6 + $0x1a8] ss:$16 sps:$4 sm:$0xff]  }
  0x5b   :  { %1778 = vmatpush1.bf16.msra.mxu0 %v2996_v35  ;;  %1736 = vmatprep.subr.bf16.mxu1 %v2997_v36  ;;  %v3047_v16 = vld [vmem:[#allocation6 + $0x424] ss:$16 sps:$4 sm:$0xff]   ;;  %v3045_v18 = vld [vmem:[#allocation6 + $0x420] ss:$16 sps:$4 sm:$0xff]   ;;  %v3072_v35 = vld [vmem:[#allocation6 + $0xa8] ss:$16 sps:$4 sm:$0xff]  }
  0x5c   :  { %1779 = vmatprep.subr.bf16.mxu0 %v2999_v37  ;;  %v3053_v20 = vld [vmem:[#allocation6 + $0x444] ss:$16 sps:$4 sm:$0xff]   ;;  %v3051_v22 = vld [vmem:[#allocation6 + $0x440] ss:$16 sps:$4 sm:$0xff]   ;;  %v3080_v37 = vld [vmem:[#allocation6 + $0xcc] ss:$16 sps:$4 sm:$0xff]  }
  0x5d   :  { %v3059_v24 = vld [vmem:[#allocation6 + $0x464] ss:$16 sps:$4 sm:$0xff]   ;;  %v3057_v26 = vld [vmem:[#allocation6 + $0x460] ss:$16 sps:$4 sm:$0xff]   ;;  %v3128_v9 = vld [vmem:[#allocation6 + $0x1cc] ss:$16 sps:$4 sm:$0xff]  }
  0x5e   :  { %1737 = vmatpush1.bf16.msra.mxu1 %v3001_v38  ;;  %v3065_v28 = vld [vmem:[#allocation6 + $0x484] ss:$16 sps:$4 sm:$0xff]   ;;  %v3063_v30 = vld [vmem:[#allocation6 + $0x480] ss:$16 sps:$4 sm:$0xff]  }
  0x5f   :  { %1780 = vmatpush1.bf16.msra.mxu0 %v3002_v39  ;;  %1738 = vmatprep.subr.bf16.mxu1 %v3003_v40  ;;  %v3071_v32 = vld [vmem:[#allocation6 + $0x4a4] ss:$16 sps:$4 sm:$0xff]   ;;  %v3069_v34 = vld [vmem:[#allocation6 + $0x4a0] ss:$16 sps:$4 sm:$0xff]   ;;  %v3078_v39 = vld [vmem:[#allocation6 + $0xc8] ss:$16 sps:$4 sm:$0xff]  }
  0x60   :  { %1781 = vmatprep.subr.bf16.mxu0 %v3005_v41  ;;  %v3077_v36 = vld [vmem:[#allocation6 + $0x4c4] ss:$16 sps:$4 sm:$0xff]   ;;  %v3075_v38 = vld [vmem:[#allocation6 + $0x4c0] ss:$16 sps:$4 sm:$0xff]   ;;  %v74_v40 = vld [vmem:[#allocation3 + $0x28] sm:$0xff] }
  0x61   :  { %v82_v41 = vld [vmem:[#allocation3 + $0x68] sm:$0xff]  ;;  %v3087_v49 = vld [vmem:[#allocation6 + $0x500] ss:$16 sps:$4 sm:$0xff]   ;;  %v3095_v51 = vld [vmem:[#allocation6 + $0x524] ss:$16 sps:$4 sm:$0xff]  }
  0x62   :  { %1739 = vmatpush1.bf16.msra.mxu1 %v3007_v42  ;;  %v3083_v42 = vld [vmem:[#allocation6 + $0x4e4] ss:$16 sps:$4 sm:$0xff]   ;;  %v3117_v6 = vld [vmem:[#allocation6 + $0x5a0] ss:$16 sps:$4 sm:$0xff]  }
  0x63   :  { %1782 = vmatpush1.bf16.msra.mxu0 %v3008_v43  ;;  %1740 = vmatprep.subr.bf16.mxu1 %v3009_v44  ;;  %v3086_v43 = vld [vmem:[#allocation6 + $0xec] ss:$16 sps:$4 sm:$0xff]   ;;  %v3627_v44 = vpack.c.bf16 %v82_v41, %v74_v40  ;;  %v3123_v10 = vld [vmem:[#allocation6 + $0x5c0] ss:$16 sps:$4 sm:$0xff]  }
  0x64   :  { %1783 = vmatprep.subr.bf16.mxu0 %v3011_v45  ;;  %v3081_v45 = vld [vmem:[#allocation6 + $0x4e0] ss:$16 sps:$4 sm:$0xff]   ;;  %v3164_v40 = vld [vmem:[#allocation6 + $0x28c] ss:$16 sps:$4 sm:$0xff]  }
  0x65   :  { %v3159_v41 = vld [vmem:[#allocation6 + $0x680] ss:$16 sps:$4 sm:$0xff]  }
  0x66   :  { %1741 = vmatpush1.bf16.msra.mxu1 %v3013_v47  ;;  %v3089_v47 = vld [vmem:[#allocation6 + $0x504] ss:$16 sps:$4 sm:$0xff]  }
  0x67   :  { %1784 = vmatpush1.bf16.msra.mxu0 %v3014_v48  ;;  %1742 = vmatprep.subr.bf16.mxu1 %v3015_v53  ;;  %v3092_v48 = vld [vmem:[#allocation6 + $0x10c] ss:$16 sps:$4 sm:$0xff]   ;;  %v3093_v53 = vld [vmem:[#allocation6 + $0x520] ss:$16 sps:$4 sm:$0xff]  }
  0x68   :  { %1785 = vmatprep.subr.bf16.mxu0 %v3017_v54  ;;  %v3096_v54 = vld [vmem:[#allocation6 + $0x128] ss:$16 sps:$4 sm:$0xff]  }
  0x6a   :  { %1743 = vmatpush1.bf16.msra.mxu1 %v3019_v56  ;;  %v3101_v56 = vld [vmem:[#allocation6 + $0x544] ss:$16 sps:$4 sm:$0xff]  }
  0x6b   :  { %1786 = vmatpush1.bf16.msra.mxu0 %v3020_v57  ;;  %1744 = vmatprep.subr.bf16.mxu1 %v3021_v58  ;;  %v3104_v57 = vld [vmem:[#allocation6 + $0x14c] ss:$16 sps:$4 sm:$0xff]   ;;  %v3099_v58 = vld [vmem:[#allocation6 + $0x540] ss:$16 sps:$4 sm:$0xff]  }
  0x6c   :  { %1787 = vmatprep.subr.bf16.mxu0 %v3023_v59  ;;  %v3102_v59 = vld [vmem:[#allocation6 + $0x148] ss:$16 sps:$4 sm:$0xff]  }
  0x6e   :  { %1745 = vmatpush1.bf16.msra.mxu1 %v3025_v60  ;;  %v3107_v60 = vld [vmem:[#allocation6 + $0x564] ss:$16 sps:$4 sm:$0xff]  }
  0x6f   :  { %1788 = vmatpush1.bf16.msra.mxu0 %v3026_v61  ;;  %1746 = vmatprep.subr.bf16.mxu1 %v3027_v62  ;;  %v3110_v61 = vld [vmem:[#allocation6 + $0x16c] ss:$16 sps:$4 sm:$0xff]   ;;  %v3105_v62 = vld [vmem:[#allocation6 + $0x560] ss:$16 sps:$4 sm:$0xff]  }
  0x70   :  { %1789 = vmatprep.subr.bf16.mxu0 %v3029_v63  ;;  %v3108_v63 = vld [vmem:[#allocation6 + $0x168] ss:$16 sps:$4 sm:$0xff]  }
  0x72   :  { %1747 = vmatpush1.bf16.msra.mxu1 %v3031_v0  ;;  %v3113_v0 = vld [vmem:[#allocation6 + $0x584] ss:$16 sps:$4 sm:$0xff]  }
  0x73   :  { %1790 = vmatpush1.bf16.msra.mxu0 %v3032_v1  ;;  %1748 = vmatprep.subr.bf16.mxu1 %v3033_v2  ;;  %v3116_v1 = vld [vmem:[#allocation6 + $0x18c] ss:$16 sps:$4 sm:$0xff]   ;;  %v3111_v2 = vld [vmem:[#allocation6 + $0x580] ss:$16 sps:$4 sm:$0xff]  }
  0x74   :  { %1791 = vmatprep.subr.bf16.mxu0 %v3035_v3  ;;  %v3114_v3 = vld [vmem:[#allocation6 + $0x188] ss:$16 sps:$4 sm:$0xff]  }
  0x76   :  { %1749 = vmatpush1.bf16.msra.mxu1 %v3037_v4  ;;  %v3119_v4 = vld [vmem:[#allocation6 + $0x5a4] ss:$16 sps:$4 sm:$0xff]  }
  0x77   :  { %1792 = vmatpush1.bf16.msra.mxu0 %v3038_v5  ;;  %1890 = vmatprep.subr.bf16.mxu1 %v3044_v11  ;;  %v3122_v5 = vld [vmem:[#allocation6 + $0x1ac] ss:$16 sps:$4 sm:$0xff]   ;;  %v3126_v11 = vld [vmem:[#allocation6 + $0x1c8] ss:$16 sps:$4 sm:$0xff]  }
  0x78   :  { %1804 = vmatprep.subr.bf16.mxu0 %v3041_v8  ;;  %v3125_v8 = vld [vmem:[#allocation6 + $0x5c4] ss:$16 sps:$4 sm:$0xff]  }
  0x79   :  { %1751 = vmatmul.mubr.bf16.vlgmr.msra.gmra.mrb[0].mxu1 %v3620_v12 }
  0x7a   :  { %1794 = vmatmul.mubr.bf16.vlgmr.msra.gmra.mrb[0].mxu0 %v3622_v15  ;;  %1891 = vmatpush1.bf16.msra.mxu1 %v3042_v14  ;;  %v3134_v14 = vld [vmem:[#allocation6 + $0x1ec] ss:$16 sps:$4 sm:$0xff]  }
  0x7b   :  { %1805 = vmatpush1.bf16.msra.mxu0 %v3039_v13  ;;  %1892 = vmatprep.subr.bf16.mxu1 %v3050_v17  ;;  %v3131_v13 = vld [vmem:[#allocation6 + $0x5e4] ss:$16 sps:$4 sm:$0xff]   ;;  %v3132_v17 = vld [vmem:[#allocation6 + $0x1e8] ss:$16 sps:$4 sm:$0xff]  }
  0x7c   :  { %1806 = vmatprep.subr.bf16.mxu0 %v3047_v16  ;;  %1922 = vmatprep.mubr.bf16.mxu1 %v3614_v50  ;;  %v3090_v50 = vld [vmem:[#allocation6 + $0x108] ss:$16 sps:$4 sm:$0xff]   ;;  %v3129_v16 = vld [vmem:[#allocation6 + $0x5e0] ss:$16 sps:$4 sm:$0xff]  }
  0x7d   :  { %1836 = vmatprep.mubr.bf16.mxu0 %v3627_v44 }
  0x7e   :  { %1893 = vmatpush1.bf16.msra.mxu1 %v3048_v19  ;;  %v73_v19 = vld [vmem:[#allocation3 + $0x20] sm:$0xff] }
  0x7f   :  { %1807 = vmatpush1.bf16.msra.mxu0 %v3045_v18  ;;  %1894 = vmatprep.subr.bf16.mxu1 %v3056_v21  ;;  %v3137_v18 = vld [vmem:[#allocation6 + $0x604] ss:$16 sps:$4 sm:$0xff]   ;;  %v3140_v21 = vld [vmem:[#allocation6 + $0x20c] ss:$16 sps:$4 sm:$0xff]  }
  0x80   :  { %1808 = vmatprep.subr.bf16.mxu0 %v3053_v20  ;;  %v81_v20 = vld [vmem:[#allocation3 + $0x60] sm:$0xff] }
  0x82   :  { %1895 = vmatpush1.bf16.msra.mxu1 %v3054_v23  ;;  %v3138_v23 = vld [vmem:[#allocation6 + $0x208] ss:$16 sps:$4 sm:$0xff]  }
  0x83   :  { %1809 = vmatpush1.bf16.msra.mxu0 %v3051_v22  ;;  %1896 = vmatprep.subr.bf16.mxu1 %v3062_v25  ;;  %v3135_v22 = vld [vmem:[#allocation6 + $0x600] ss:$16 sps:$4 sm:$0xff]   ;;  %v3143_v25 = vld [vmem:[#allocation6 + $0x624] ss:$16 sps:$4 sm:$0xff]  }
  0x84   :  { %1810 = vmatprep.subr.bf16.mxu0 %v3059_v24  ;;  %v3630_v24 = vpack.c.bf16 %v81_v20, %v73_v19  ;;  %v3224_v19 = vld [vmem:[#allocation6 + $0x3cc] ss:$16 sps:$4 sm:$0xff]   ;;  %v3219_v20 = vld [vmem:[#allocation6 + $0x7c0] ss:$16 sps:$4 sm:$0xff]  }
  0x86   :  { %1897 = vmatpush1.bf16.msra.mxu1 %v3060_v27  ;;  %v3141_v27 = vld [vmem:[#allocation6 + $0x620] ss:$16 sps:$4 sm:$0xff]  }
  0x87   :  { %1811 = vmatpush1.bf16.msra.mxu0 %v3057_v26  ;;  %1898 = vmatprep.subr.bf16.mxu1 %v3068_v29  ;;  %v3146_v26 = vld [vmem:[#allocation6 + $0x22c] ss:$16 sps:$4 sm:$0xff]   ;;  %v3149_v29 = vld [vmem:[#allocation6 + $0x644] ss:$16 sps:$4 sm:$0xff]  }
  0x88   :  { %1812 = vmatprep.subr.bf16.mxu0 %v3065_v28  ;;  %v3144_v28 = vld [vmem:[#allocation6 + $0x228] ss:$16 sps:$4 sm:$0xff]  }
  0x8a   :  { %1899 = vmatpush1.bf16.msra.mxu1 %v3066_v31  ;;  %v84_v31 = vld [vmem:[#allocation3 + $0x78] sm:$0xff] }
  0x8b   :  { %1813 = vmatpush1.bf16.msra.mxu0 %v3063_v30  ;;  %1900 = vmatprep.subr.bf16.mxu1 %v3074_v33  ;;  %v76_v30 = vld [vmem:[#allocation3 + $0x38] sm:$0xff] }
  0x8c   :  { %1814 = vmatprep.subr.bf16.mxu0 %v3071_v32  ;;  %v3152_v32 = vld [vmem:[#allocation6 + $0x24c] ss:$16 sps:$4 sm:$0xff]   ;;  %v3634_v33 = vpack.c.bf16 %v84_v31, %v76_v30  ;;  %v3231_v30 = vld [vmem:[#allocation6 + $0x408] ss:$16 sps:$4 sm:$0xff]  }
  0x8e   :  { %1901 = vmatpush1.bf16.msra.mxu1 %v3072_v35  ;;  %v3150_v35 = vld [vmem:[#allocation6 + $0x248] ss:$16 sps:$4 sm:$0xff]  }
  0x8f   :  { %1815 = vmatpush1.bf16.msra.mxu0 %v3069_v34  ;;  %1902 = vmatprep.subr.bf16.mxu1 %v3080_v37  ;;  %v3147_v34 = vld [vmem:[#allocation6 + $0x640] ss:$16 sps:$4 sm:$0xff]  }
  0x90   :  { %1816 = vmatprep.subr.bf16.mxu0 %v3077_v36  ;;  %v3158_v36 = vld [vmem:[#allocation6 + $0x26c] ss:$16 sps:$4 sm:$0xff]   ;;  %v3153_v37 = vld [vmem:[#allocation6 + $0x660] ss:$16 sps:$4 sm:$0xff]  }
  0x92   :  { %1903 = vmatpush1.bf16.msra.mxu1 %v3078_v39  ;;  %v3161_v39 = vld [vmem:[#allocation6 + $0x684] ss:$16 sps:$4 sm:$0xff]  }
  0x93   :  { %1817 = vmatpush1.bf16.msra.mxu0 %v3075_v38  ;;  %1904 = vmatprep.subr.bf16.mxu1 %v3086_v43  ;;  %v3156_v38 = vld [vmem:[#allocation6 + $0x268] ss:$16 sps:$4 sm:$0xff]   ;;  %v3170_v43 = vld [vmem:[#allocation6 + $0x2ac] ss:$16 sps:$4 sm:$0xff]  }
  0x94   :  { %1818 = vmatprep.subr.bf16.mxu0 %v3083_v42  ;;  %v3167_v42 = vld [vmem:[#allocation6 + $0x6a4] ss:$16 sps:$4 sm:$0xff]  }
  0x96   :  { %1905 = vmatpush1.bf16.msra.mxu1 %v3084_v46  ;;  %v3168_v46 = vld [vmem:[#allocation6 + $0x2a8] ss:$16 sps:$4 sm:$0xff]  }
  0x97   :  { %1819 = vmatpush1.bf16.msra.mxu0 %v3081_v45  ;;  %1906 = vmatprep.subr.bf16.mxu1 %v3092_v48  ;;  %v3165_v45 = vld [vmem:[#allocation6 + $0x6a0] ss:$16 sps:$4 sm:$0xff]   ;;  %v3176_v48 = vld [vmem:[#allocation6 + $0x2cc] ss:$16 sps:$4 sm:$0xff]  }
  0x98   :  { %1820 = vmatprep.subr.bf16.mxu0 %v3089_v47  ;;  %v3173_v47 = vld [vmem:[#allocation6 + $0x6c4] ss:$16 sps:$4 sm:$0xff]  }
  0x9a   :  { %1907 = vmatpush1.bf16.msra.mxu1 %v3090_v50  ;;  %v3174_v50 = vld [vmem:[#allocation6 + $0x2c8] ss:$16 sps:$4 sm:$0xff]  }
  0x9b   :  { %1821 = vmatpush1.bf16.msra.mxu0 %v3087_v49  ;;  %1908 = vmatprep.subr.bf16.mxu1 %v3098_v52  ;;  %v3171_v49 = vld [vmem:[#allocation6 + $0x6c0] ss:$16 sps:$4 sm:$0xff]   ;;  %v3182_v52 = vld [vmem:[#allocation6 + $0x2ec] ss:$16 sps:$4 sm:$0xff]  }
  0x9c   :  { %1822 = vmatprep.subr.bf16.mxu0 %v3095_v51  ;;  %v3179_v51 = vld [vmem:[#allocation6 + $0x6e4] ss:$16 sps:$4 sm:$0xff]  }
  0x9e   :  { %1909 = vmatpush1.bf16.msra.mxu1 %v3096_v54  ;;  %v3180_v54 = vld [vmem:[#allocation6 + $0x2e8] ss:$16 sps:$4 sm:$0xff]  }
  0x9f   :  { %1823 = vmatpush1.bf16.msra.mxu0 %v3093_v53  ;;  %1910 = vmatprep.subr.bf16.mxu1 %v3104_v57  ;;  %v3177_v53 = vld [vmem:[#allocation6 + $0x6e0] ss:$16 sps:$4 sm:$0xff]   ;;  %v3188_v57 = vld [vmem:[#allocation6 + $0x30c] ss:$16 sps:$4 sm:$0xff]  }
  0xa0   :  { %1824 = vmatprep.subr.bf16.mxu0 %v3101_v56  ;;  %v3185_v56 = vld [vmem:[#allocation6 + $0x704] ss:$16 sps:$4 sm:$0xff]  }
  0xa2   :  { %1911 = vmatpush1.bf16.msra.mxu1 %v3102_v59  ;;  %v3186_v59 = vld [vmem:[#allocation6 + $0x308] ss:$16 sps:$4 sm:$0xff]  }
  0xa3   :  { %1825 = vmatpush1.bf16.msra.mxu0 %v3099_v58  ;;  %1912 = vmatprep.subr.bf16.mxu1 %v3110_v61  ;;  %v3183_v58 = vld [vmem:[#allocation6 + $0x700] ss:$16 sps:$4 sm:$0xff]   ;;  %v3194_v61 = vld [vmem:[#allocation6 + $0x32c] ss:$16 sps:$4 sm:$0xff]  }
  0xa4   :  { %1826 = vmatprep.subr.bf16.mxu0 %v3107_v60  ;;  %v3191_v60 = vld [vmem:[#allocation6 + $0x724] ss:$16 sps:$4 sm:$0xff]  }
  0xa6   :  { %1913 = vmatpush1.bf16.msra.mxu1 %v3108_v63  ;;  %v3192_v63 = vld [vmem:[#allocation6 + $0x328] ss:$16 sps:$4 sm:$0xff]  }
  0xa7   :  { %1827 = vmatpush1.bf16.msra.mxu0 %v3105_v62  ;;  %1914 = vmatprep.subr.bf16.mxu1 %v3116_v1  ;;  %v3189_v62 = vld [vmem:[#allocation6 + $0x720] ss:$16 sps:$4 sm:$0xff]   ;;  %v3200_v1 = vld [vmem:[#allocation6 + $0x34c] ss:$16 sps:$4 sm:$0xff]  }
  0xa8   :  { %1828 = vmatprep.subr.bf16.mxu0 %v3113_v0  ;;  %v3197_v0 = vld [vmem:[#allocation6 + $0x744] ss:$16 sps:$4 sm:$0xff]  }
  0xaa   :  { %1915 = vmatpush1.bf16.msra.mxu1 %v3114_v3  ;;  %v3198_v3 = vld [vmem:[#allocation6 + $0x348] ss:$16 sps:$4 sm:$0xff]  }
  0xab   :  { %1829 = vmatpush1.bf16.msra.mxu0 %v3111_v2  ;;  %1916 = vmatprep.subr.bf16.mxu1 %v3122_v5  ;;  %v3195_v2 = vld [vmem:[#allocation6 + $0x740] ss:$16 sps:$4 sm:$0xff]   ;;  %v3206_v5 = vld [vmem:[#allocation6 + $0x36c] ss:$16 sps:$4 sm:$0xff]  }
  0xac   :  { %1830 = vmatprep.subr.bf16.mxu0 %v3119_v4  ;;  %v3203_v4 = vld [vmem:[#allocation6 + $0x764] ss:$16 sps:$4 sm:$0xff]  }
  0xae   :  { %1917 = vmatpush1.bf16.msra.mxu1 %v3120_v7  ;;  %v3204_v7 = vld [vmem:[#allocation6 + $0x368] ss:$16 sps:$4 sm:$0xff]  }
  0xaf   :  { %1831 = vmatpush1.bf16.msra.mxu0 %v3117_v6  ;;  %1918 = vmatprep.subr.bf16.mxu1 %v3128_v9  ;;  %v3201_v6 = vld [vmem:[#allocation6 + $0x760] ss:$16 sps:$4 sm:$0xff]   ;;  %v3212_v9 = vld [vmem:[#allocation6 + $0x38c] ss:$16 sps:$4 sm:$0xff]  }
  0xb0   :  { %1832 = vmatprep.subr.bf16.mxu0 %v3125_v8  ;;  %v3209_v8 = vld [vmem:[#allocation6 + $0x784] ss:$16 sps:$4 sm:$0xff]  }
  0xb2   :  { %1919 = vmatpush1.bf16.msra.mxu1 %v3126_v11  ;;  %v3210_v11 = vld [vmem:[#allocation6 + $0x388] ss:$16 sps:$4 sm:$0xff]  }
  0xb3   :  { %1833 = vmatpush1.bf16.msra.mxu0 %v3123_v10  ;;  %1920 = vmatprep.subr.bf16.mxu1 %v3134_v14  ;;  %v3207_v10 = vld [vmem:[#allocation6 + $0x780] ss:$16 sps:$4 sm:$0xff]   ;;  %v3218_v14 = vld [vmem:[#allocation6 + $0x3ac] ss:$16 sps:$4 sm:$0xff]  }
  0xb4   :  { %1834 = vmatprep.subr.bf16.mxu0 %v3131_v13  ;;  %v3215_v13 = vld [vmem:[#allocation6 + $0x7a4] ss:$16 sps:$4 sm:$0xff]  }
  0xb6   :  { %1921 = vmatpush1.bf16.msra.mxu1 %v3132_v17  ;;  %v3216_v17 = vld [vmem:[#allocation6 + $0x3a8] ss:$16 sps:$4 sm:$0xff]  }
  0xb7   :  { %1835 = vmatpush1.bf16.msra.mxu0 %v3129_v16  ;;  %1933 = vmatprep.subr.bf16.mxu1 %v3140_v21  ;;  %v3213_v16 = vld [vmem:[#allocation6 + $0x7a0] ss:$16 sps:$4 sm:$0xff]   ;;  %v3222_v21 = vld [vmem:[#allocation6 + $0x3c8] ss:$16 sps:$4 sm:$0xff]  }
  0xb8   :  { %1847 = vmatprep.subr.bf16.mxu0 %v3137_v18  ;;  %v3221_v18 = vld [vmem:[#allocation6 + $0x7c4] ss:$16 sps:$4 sm:$0xff]  }
  0xb9   :  { %1923 = vmatmul.mubr.bf16.vlgmr.msra.gmra.mrb[4].mxu1 %v3620_v12  ;;  %v3155_v12 = vld [vmem:[#allocation6 + $0x664] ss:$16 sps:$4 sm:$0xff]  }
  0xba   :  { %1837 = vmatmul.mubr.bf16.vlgmr.msra.gmra.mrb[0].mxu0 %v3630_v24  ;;  %1934 = vmatpush1.bf16.msra.mxu1 %v3138_v23  ;;  %v3230_v23 = vld [vmem:[#allocation6 + $0x3ec] ss:$16 sps:$4 sm:$0xff]  }
  0xbb   :  { %1848 = vmatpush1.bf16.msra.mxu0 %v3135_v22  ;;  %1935 = vmatprep.subr.bf16.mxu1 %v3146_v26  ;;  %v3227_v22 = vld [vmem:[#allocation6 + $0x7e4] ss:$16 sps:$4 sm:$0xff]   ;;  %v3228_v26 = vld [vmem:[#allocation6 + $0x3e8] ss:$16 sps:$4 sm:$0xff]  }
  0xbc   :  { %1849 = vmatprep.subr.bf16.mxu0 %v3143_v25  ;;  %1965 = vmatprep.mubr.bf16.mxu1 %v3616_v55  ;;  %v3162_v55 = vld [vmem:[#allocation6 + $0x288] ss:$16 sps:$4 sm:$0xff]   ;;  %v3225_v25 = vld [vmem:[#allocation6 + $0x7e0] ss:$16 sps:$4 sm:$0xff]  }
  0xbd   :  { %1879 = vmatprep.mubr.bf16.mxu0 %v3634_v33 }
  0xbe   :  { %1936 = vmatpush1.bf16.msra.mxu1 %v3144_v28  ;;  %v83_v28 = vld [vmem:[#allocation3 + $0x70] sm:$0xff] }
  0xbf   :  { %1850 = vmatpush1.bf16.msra.mxu0 %v3141_v27  ;;  %1937 = vmatprep.subr.bf16.mxu1 %v3152_v32  ;;  %v75_v27 = vld [vmem:[#allocation3 + $0x30] sm:$0xff]  ;;  %v3236_v32 = vld [vmem:[#allocation6 + $0x42c] ss:$16 sps:$4 sm:$0xff]  }
  0xc0   :  { %1851 = vmatprep.subr.bf16.mxu0 %v3149_v29  ;;  %v3233_v29 = vld [vmem:[#allocation6 + $0x40c] ss:$16 sps:$4 sm:$0xff]   ;;  %v3638_v31 = vpack.c.bf16 %v83_v28, %v75_v27  ;;  %v3279_v27 = vld [vmem:[#allocation6 + $0x608] ss:$16 sps:$4 sm:$0xff]  }
  0xc1   :  { %v3284_v28 = vld [vmem:[#allocation6 + $0x62c] ss:$16 sps:$4 sm:$0xff]  }
  0xc2   :  { %1938 = vmatpush1.bf16.msra.mxu1 %v3150_v35  ;;  %v3329_v35 = vld [vmem:[#allocation8 + $0x4] ss:$8 sps:$4 sm:$0xff]  }
  0xc3   :  { %1852 = vmatpush1.bf16.msra.mxu0 %v3147_v34  ;;  %1939 = vmatprep.subr.bf16.mxu1 %v3158_v36  ;;  %v3327_v34 = vld [vmem:[#allocation8] ss:$8 sps:$4 sm:$0xff]   ;;  %v3332_v36 = vld [vmem:[#allocation8 + $0x14] ss:$8 sps:$4 sm:$0xff]  }
  0xc4   :  { %1853 = vmatprep.subr.bf16.mxu0 %v3155_v12  ;;  %v3234_v12 = vld [vmem:[#allocation6 + $0x428] ss:$16 sps:$4 sm:$0xff]  }
  0xc6   :  { %1940 = vmatpush1.bf16.msra.mxu1 %v3156_v38  ;;  %v3330_v38 = vld [vmem:[#allocation8 + $0x10] ss:$8 sps:$4 sm:$0xff]  }
  0xc7   :  { %1854 = vmatpush1.bf16.msra.mxu0 %v3153_v37  ;;  %1941 = vmatprep.subr.bf16.mxu1 %v3164_v40  ;;  %v3239_v37 = vld [vmem:[#allocation6 + $0x44c] ss:$16 sps:$4 sm:$0xff]   ;;  %v3237_v40 = vld [vmem:[#allocation6 + $0x448] ss:$16 sps:$4 sm:$0xff]  }
  0xc8   :  { %1855 = vmatprep.subr.bf16.mxu0 %v3161_v39  ;;  %v3335_v39 = vld [vmem:[#allocation8 + $0x24] ss:$8 sps:$4 sm:$0xff]  }
  0xca   :  { %1942 = vmatpush1.bf16.msra.mxu1 %v3162_v55  ;;  %v3240_v55 = vld [vmem:[#allocation6 + $0x468] ss:$16 sps:$4 sm:$0xff]  }
  0xcb   :  { %1856 = vmatpush1.bf16.msra.mxu0 %v3159_v41  ;;  %1943 = vmatprep.subr.bf16.mxu1 %v3170_v43  ;;  %v3242_v41 = vld [vmem:[#allocation6 + $0x46c] ss:$16 sps:$4 sm:$0xff]  }
  0xcc   :  { %1857 = vmatprep.subr.bf16.mxu0 %v3167_v42  ;;  %v3245_v42 = vld [vmem:[#allocation6 + $0x48c] ss:$16 sps:$4 sm:$0xff]  }
  0xcd   :  { %v3338_v43 = vld [vmem:[#allocation8 + $0x34] ss:$8 sps:$4 sm:$0xff]  }
  0xce   :  { %1944 = vmatpush1.bf16.msra.mxu1 %v3168_v46  ;;  %v3243_v46 = vld [vmem:[#allocation6 + $0x488] ss:$16 sps:$4 sm:$0xff]  }
  0xcf   :  { %1858 = vmatpush1.bf16.msra.mxu0 %v3165_v45  ;;  %1945 = vmatprep.subr.bf16.mxu1 %v3176_v48  ;;  %v3341_v45 = vld [vmem:[#allocation8 + $0x44] ss:$8 sps:$4 sm:$0xff]   ;;  %v3339_v48 = vld [vmem:[#allocation8 + $0x40] ss:$8 sps:$4 sm:$0xff]  }
  0xd0   :  { %1859 = vmatprep.subr.bf16.mxu0 %v3173_v47  ;;  %v3248_v47 = vld [vmem:[#allocation6 + $0x4ac] ss:$16 sps:$4 sm:$0xff]  }
  0xd2   :  { %1946 = vmatpush1.bf16.msra.mxu1 %v3174_v50  ;;  %v3246_v50 = vld [vmem:[#allocation6 + $0x4a8] ss:$16 sps:$4 sm:$0xff]  }
  0xd3   :  { %1860 = vmatpush1.bf16.msra.mxu0 %v3171_v49  ;;  %1947 = vmatprep.subr.bf16.mxu1 %v3182_v52  ;;  %v3344_v49 = vld [vmem:[#allocation8 + $0x54] ss:$8 sps:$4 sm:$0xff]   ;;  %v3342_v52 = vld [vmem:[#allocation8 + $0x50] ss:$8 sps:$4 sm:$0xff]  }
  0xd4   :  { %1861 = vmatprep.subr.bf16.mxu0 %v3179_v51  ;;  %v3251_v51 = vld [vmem:[#allocation6 + $0x4cc] ss:$16 sps:$4 sm:$0xff]  }
  0xd6   :  { %1948 = vmatpush1.bf16.msra.mxu1 %v3180_v54  ;;  %v3249_v54 = vld [vmem:[#allocation6 + $0x4c8] ss:$16 sps:$4 sm:$0xff]  }
  0xd7   :  { %1862 = vmatpush1.bf16.msra.mxu0 %v3177_v53  ;;  %1949 = vmatprep.subr.bf16.mxu1 %v3188_v57  ;;  %v3347_v53 = vld [vmem:[#allocation8 + $0x64] ss:$8 sps:$4 sm:$0xff]   ;;  %v3345_v57 = vld [vmem:[#allocation8 + $0x60] ss:$8 sps:$4 sm:$0xff]  }
  0xd8   :  { %1863 = vmatprep.subr.bf16.mxu0 %v3185_v56  ;;  %v3254_v56 = vld [vmem:[#allocation6 + $0x4ec] ss:$16 sps:$4 sm:$0xff]  }
  0xda   :  { %1950 = vmatpush1.bf16.msra.mxu1 %v3186_v59  ;;  %v3252_v59 = vld [vmem:[#allocation6 + $0x4e8] ss:$16 sps:$4 sm:$0xff]  }
  0xdb   :  { %1864 = vmatpush1.bf16.msra.mxu0 %v3183_v58  ;;  %1951 = vmatprep.subr.bf16.mxu1 %v3194_v61  ;;  %v3350_v58 = vld [vmem:[#allocation8 + $0x74] ss:$8 sps:$4 sm:$0xff]   ;;  %v3348_v61 = vld [vmem:[#allocation8 + $0x70] ss:$8 sps:$4 sm:$0xff]  }
  0xdc   :  { %1865 = vmatprep.subr.bf16.mxu0 %v3191_v60  ;;  %v3257_v60 = vld [vmem:[#allocation6 + $0x50c] ss:$16 sps:$4 sm:$0xff]  }
  0xde   :  { %1952 = vmatpush1.bf16.msra.mxu1 %v3192_v63  ;;  %v3255_v63 = vld [vmem:[#allocation6 + $0x508] ss:$16 sps:$4 sm:$0xff]  }
  0xdf   :  { %1866 = vmatpush1.bf16.msra.mxu0 %v3189_v62  ;;  %1953 = vmatprep.subr.bf16.mxu1 %v3200_v1  ;;  %v3353_v62 = vld [vmem:[#allocation8 + $0x84] ss:$8 sps:$4 sm:$0xff]   ;;  %v3351_v1 = vld [vmem:[#allocation8 + $0x80] ss:$8 sps:$4 sm:$0xff]  }
  0xe0   :  { %1867 = vmatprep.subr.bf16.mxu0 %v3197_v0  ;;  %v3260_v0 = vld [vmem:[#allocation6 + $0x52c] ss:$16 sps:$4 sm:$0xff]  }
  0xe2   :  { %1954 = vmatpush1.bf16.msra.mxu1 %v3198_v3  ;;  %v3258_v3 = vld [vmem:[#allocation6 + $0x528] ss:$16 sps:$4 sm:$0xff]  }
  0xe3   :  { %1868 = vmatpush1.bf16.msra.mxu0 %v3195_v2  ;;  %1955 = vmatprep.subr.bf16.mxu1 %v3206_v5  ;;  %v3356_v2 = vld [vmem:[#allocation8 + $0x94] ss:$8 sps:$4 sm:$0xff]   ;;  %v3354_v5 = vld [vmem:[#allocation8 + $0x90] ss:$8 sps:$4 sm:$0xff]  }
  0xe4   :  { %1869 = vmatprep.subr.bf16.mxu0 %v3203_v4  ;;  %v3263_v4 = vld [vmem:[#allocation6 + $0x54c] ss:$16 sps:$4 sm:$0xff]  }
  0xe6   :  { %1956 = vmatpush1.bf16.msra.mxu1 %v3204_v7  ;;  %v3261_v7 = vld [vmem:[#allocation6 + $0x548] ss:$16 sps:$4 sm:$0xff]  }
  0xe7   :  { %1870 = vmatpush1.bf16.msra.mxu0 %v3201_v6  ;;  %1957 = vmatprep.subr.bf16.mxu1 %v3212_v9  ;;  %v3359_v6 = vld [vmem:[#allocation8 + $0xa4] ss:$8 sps:$4 sm:$0xff]   ;;  %v3357_v9 = vld [vmem:[#allocation8 + $0xa0] ss:$8 sps:$4 sm:$0xff]  }
  0xe8   :  { %1871 = vmatprep.subr.bf16.mxu0 %v3209_v8  ;;  %v3266_v8 = vld [vmem:[#allocation6 + $0x56c] ss:$16 sps:$4 sm:$0xff]  }
  0xea   :  { %1958 = vmatpush1.bf16.msra.mxu1 %v3210_v11  ;;  %v3264_v11 = vld [vmem:[#allocation6 + $0x568] ss:$16 sps:$4 sm:$0xff]  }
  0xeb   :  { %1872 = vmatpush1.bf16.msra.mxu0 %v3207_v10  ;;  %1959 = vmatprep.subr.bf16.mxu1 %v3218_v14  ;;  %v3362_v10 = vld [vmem:[#allocation8 + $0xb4] ss:$8 sps:$4 sm:$0xff]   ;;  %v3360_v14 = vld [vmem:[#allocation8 + $0xb0] ss:$8 sps:$4 sm:$0xff]  }
  0xec   :  { %1873 = vmatprep.subr.bf16.mxu0 %v3215_v13  ;;  %v3269_v13 = vld [vmem:[#allocation6 + $0x58c] ss:$16 sps:$4 sm:$0xff]  }
  0xee   :  { %1960 = vmatpush1.bf16.msra.mxu1 %v3216_v17  ;;  %v3267_v17 = vld [vmem:[#allocation6 + $0x588] ss:$16 sps:$4 sm:$0xff]  }
  0xef   :  { %1874 = vmatpush1.bf16.msra.mxu0 %v3213_v16  ;;  %1961 = vmatprep.subr.bf16.mxu1 %v3224_v19  ;;  %v3365_v16 = vld [vmem:[#allocation8 + $0xc4] ss:$8 sps:$4 sm:$0xff]   ;;  %v3363_v19 = vld [vmem:[#allocation8 + $0xc0] ss:$8 sps:$4 sm:$0xff]  }
  0xf0   :  { %1875 = vmatprep.subr.bf16.mxu0 %v3221_v18  ;;  %v3272_v18 = vld [vmem:[#allocation6 + $0x5ac] ss:$16 sps:$4 sm:$0xff]  }
  0xf2   :  { %1962 = vmatpush1.bf16.msra.mxu1 %v3222_v21  ;;  %v3275_v21 = vld [vmem:[#allocation6 + $0x5cc] ss:$16 sps:$4 sm:$0xff]  }
  0xf3   :  { %1876 = vmatpush1.bf16.msra.mxu0 %v3219_v20  ;;  %1963 = vmatprep.subr.bf16.mxu1 %v3230_v23  ;;  %v3270_v20 = vld [vmem:[#allocation6 + $0x5a8] ss:$16 sps:$4 sm:$0xff]   ;;  %v3278_v23 = vld [vmem:[#allocation6 + $0x5ec] ss:$16 sps:$4 sm:$0xff]  }
  0xf4   :  { %1877 = vmatprep.subr.bf16.mxu0 %v3227_v22  ;;  %v3273_v22 = vld [vmem:[#allocation6 + $0x5c8] ss:$16 sps:$4 sm:$0xff]  }
  0xf6   :  { %1964 = vmatpush1.bf16.msra.mxu1 %v3228_v26  ;;  %v3281_v26 = vld [vmem:[#allocation6 + $0x60c] ss:$16 sps:$4 sm:$0xff]  }
  0xf7   :  { %1878 = vmatpush1.bf16.msra.mxu0 %v3225_v25  ;;  %1976 = vmatprep.subr.bf16.mxu1 %v3233_v29  ;;  %v3276_v25 = vld [vmem:[#allocation6 + $0x5e8] ss:$16 sps:$4 sm:$0xff]  }
  0xf8   :  { %2421 = vmatprep.subr.bf16.mxu0 %v3329_v35  ;;  %v3282_v29 = vld [vmem:[#allocation6 + $0x628] ss:$16 sps:$4 sm:$0xff]  }
  0xf9   :  { %1966 = vmatmul.mubr.bf16.vlgmr.msra.gmra.mrb[4].mxu1 %v3622_v15  ;;  %v3333_v15 = vld [vmem:[#allocation8 + $0x20] ss:$8 sps:$4 sm:$0xff]  }
  0xfa   :  { %1880 = vmatmul.mubr.bf16.vlgmr.msra.gmra.mrb[0].mxu0 %v3638_v31  ;;  %1977 = vmatpush1.bf16.msra.mxu1 %v3231_v30  ;;  %v3287_v30 = vld [vmem:[#allocation6 + $0x64c] ss:$16 sps:$4 sm:$0xff]   ;;  %v3288_v35 = vld [vmem:[#allocation6 + $0x668] ss:$16 sps:$4 sm:$0xff]  }
  0xfb   :  { %2008 = vmatprep.mubr.bf16.mxu1 %v3627_v44  ;;  %1978 = vmatprep.subr.bf16.mxu1 %v3236_v32  ;;  %v3336_v44 = vld [vmem:[#allocation8 + $0x30] ss:$8 sps:$4 sm:$0xff]  }
  0xfc   :  { %2422 = vmatpush1.bf16.msra.mxu0 %v3327_v34  ;;  %v3285_v32 = vld [vmem:[#allocation6 + $0x648] ss:$16 sps:$4 sm:$0xff]   ;;  %v3290_v34 = vld [vmem:[#allocation6 + $0x66c] ss:$16 sps:$4 sm:$0xff]  }
  0xfd   :  { %2423 = vmatprep.subr.bf16.mxu0 %v3332_v36  ;;  %v3291_v36 = vld [vmem:[#allocation6 + $0x688] ss:$16 sps:$4 sm:$0xff]  }
  0xfe   :  { %1979 = vmatpush1.bf16.msra.mxu1 %v3234_v12  ;;  %v3293_v12 = vld [vmem:[#allocation6 + $0x68c] ss:$16 sps:$4 sm:$0xff]  }
  0xff   :  { %1980 = vmatprep.subr.bf16.mxu1 %v3239_v37  ;;  %v3296_v37 = vld [vmem:[#allocation6 + $0x6ac] ss:$16 sps:$4 sm:$0xff]  }
 0x100   :  { %2424 = vmatpush1.bf16.msra.mxu0 %v3330_v38  ;;  %v3368_v38 = vld [vmem:[#allocation8 + $0xd4] ss:$8 sps:$4 sm:$0xff]  }
 0x101   :  { %2425 = vmatprep.subr.bf16.mxu0 %v3335_v39  ;;  %v3299_v39 = vld [vmem:[#allocation6 + $0x6cc] ss:$16 sps:$4 sm:$0xff]  }
 0x102   :  { %1981 = vmatpush1.bf16.msra.mxu1 %v3237_v40 }
 0x103   :  { %1982 = vmatprep.subr.bf16.mxu1 %v3242_v41 }
 0x104   :  { %2426 = vmatpush1.bf16.msra.mxu0 %v3333_v15  ;;  %v3297_v15 = vld [vmem:[#allocation6 + $0x6c8] ss:$16 sps:$4 sm:$0xff]  }
 0x105   :  { %2427 = vmatprep.subr.bf16.mxu0 %v3338_v43 }
 0x106   :  { %1983 = vmatpush1.bf16.msra.mxu1 %v3240_v55 }
 0x107   :  { %1984 = vmatprep.subr.bf16.mxu1 %v3245_v42  ;;  %v3371_v42 = vld [vmem:[#allocation8 + $0xe4] ss:$8 sps:$4 sm:$0xff]  }
 0x108   :  { %2428 = vmatpush1.bf16.msra.mxu0 %v3336_v44  ;;  %v3302_v44 = vld [vmem:[#allocation6 + $0x6ec] ss:$16 sps:$4 sm:$0xff]  }
 0x109   :  { %2429 = vmatprep.subr.bf16.mxu0 %v3341_v45  ;;  %v3369_v45 = vld [vmem:[#allocation8 + $0xe0] ss:$8 sps:$4 sm:$0xff]  }
 0x10a   :  { %1985 = vmatpush1.bf16.msra.mxu1 %v3243_v46  ;;  %v3300_v46 = vld [vmem:[#allocation6 + $0x6e8] ss:$16 sps:$4 sm:$0xff]  }
 0x10b   :  { %1986 = vmatprep.subr.bf16.mxu1 %v3248_v47  ;;  %v3374_v47 = vld [vmem:[#allocation8 + $0xf4] ss:$8 sps:$4 sm:$0xff]  }
 0x10c   :  { %2430 = vmatpush1.bf16.msra.mxu0 %v3339_v48  ;;  %v3305_v48 = vld [vmem:[#allocation6 + $0x70c] ss:$16 sps:$4 sm:$0xff]  }
 0x10d   :  { %2431 = vmatprep.subr.bf16.mxu0 %v3344_v49  ;;  %v3372_v49 = vld [vmem:[#allocation8 + $0xf0] ss:$8 sps:$4 sm:$0xff]  }
 0x10e   :  { %1987 = vmatpush1.bf16.msra.mxu1 %v3246_v50  ;;  %v3303_v50 = vld [vmem:[#allocation6 + $0x708] ss:$16 sps:$4 sm:$0xff]  }
 0x10f   :  { %1988 = vmatprep.subr.bf16.mxu1 %v3251_v51  ;;  %v3308_v51 = vld [vmem:[#allocation6 + $0x72c] ss:$16 sps:$4 sm:$0xff]  }
 0x110   :  { %2432 = vmatpush1.bf16.msra.mxu0 %v3342_v52  ;;  %v3377_v52 = vld [vmem:[#allocation8 + $0x104] ss:$8 sps:$4 sm:$0xff]  }
 0x111   :  { %2433 = vmatprep.subr.bf16.mxu0 %v3347_v53  ;;  %v3306_v53 = vld [vmem:[#allocation6 + $0x728] ss:$16 sps:$4 sm:$0xff]  }
 0x112   :  { %1989 = vmatpush1.bf16.msra.mxu1 %v3249_v54  ;;  %v3311_v54 = vld [vmem:[#allocation6 + $0x74c] ss:$16 sps:$4 sm:$0xff]  }
 0x113   :  { %1990 = vmatprep.subr.bf16.mxu1 %v3254_v56  ;;  %v3309_v56 = vld [vmem:[#allocation6 + $0x748] ss:$16 sps:$4 sm:$0xff]  }
 0x114   :  { %2434 = vmatpush1.bf16.msra.mxu0 %v3345_v57  ;;  %v3314_v57 = vld [vmem:[#allocation6 + $0x76c] ss:$16 sps:$4 sm:$0xff]  }
 0x115   :  { %2435 = vmatprep.subr.bf16.mxu0 %v3350_v58  ;;  %v3312_v58 = vld [vmem:[#allocation6 + $0x768] ss:$16 sps:$4 sm:$0xff]  }
 0x116   :  { %1991 = vmatpush1.bf16.msra.mxu1 %v3252_v59  ;;  %v3317_v59 = vld [vmem:[#allocation6 + $0x78c] ss:$16 sps:$4 sm:$0xff]  }
 0x117   :  { %1992 = vmatprep.subr.bf16.mxu1 %v3257_v60  ;;  %v3315_v60 = vld [vmem:[#allocation6 + $0x788] ss:$16 sps:$4 sm:$0xff]  }
 0x118   :  { %2436 = vmatpush1.bf16.msra.mxu0 %v3348_v61  ;;  %v3320_v61 = vld [vmem:[#allocation6 + $0x7ac] ss:$16 sps:$4 sm:$0xff]  }
 0x119   :  { %2437 = vmatprep.subr.bf16.mxu0 %v3353_v62  ;;  %v3318_v62 = vld [vmem:[#allocation6 + $0x7a8] ss:$16 sps:$4 sm:$0xff]  }
 0x11a   :  { %1993 = vmatpush1.bf16.msra.mxu1 %v3255_v63  ;;  %v3323_v63 = vld [vmem:[#allocation6 + $0x7cc] ss:$16 sps:$4 sm:$0xff]  }
 0x11b   :  { %1994 = vmatprep.subr.bf16.mxu1 %v3260_v0  ;;  %v3321_v0 = vld [vmem:[#allocation6 + $0x7c8] ss:$16 sps:$4 sm:$0xff]  }
 0x11c   :  { %2438 = vmatpush1.bf16.msra.mxu0 %v3351_v1  ;;  %v3326_v1 = vld [vmem:[#allocation6 + $0x7ec] ss:$16 sps:$4 sm:$0xff]  }
 0x11d   :  { %2439 = vmatprep.subr.bf16.mxu0 %v3356_v2  ;;  %v3324_v2 = vld [vmem:[#allocation6 + $0x7e8] ss:$16 sps:$4 sm:$0xff]  }
 0x11e   :  { %1995 = vmatpush1.bf16.msra.mxu1 %v3258_v3  ;;  %v418_v3 = vlaneseq }
 0x11f   :  { %1996 = vmatprep.subr.bf16.mxu1 %v3263_v4 }
 0x120   :  { %2440 = vmatpush1.bf16.msra.mxu0 %v3354_v5  ;;  %v3652_v4 = vshrl.u32 %v418_v3, 7 }
 0x121   :  { %2441 = vmatprep.subr.bf16.mxu0 %v3359_v6  ;;  %v3660_v6 = vld [vmem:[%s3706_s2] sm:$0xf] }
 0x122   :  { %1997 = vmatpush1.bf16.msra.mxu1 %v3261_v7  ;;  %v3655_v5 = vsub.s32 0, %v3652_v4  ;;  %v3663_v7 = vsub.s32 1, %v3652_v4 }
 0x123   :  { %1998 = vmatprep.subr.bf16.mxu1 %v3266_v8 }
 0x124   :  { %2442 = vmatpush1.bf16.msra.mxu0 %v3357_v9  ;;  %v421_v8 = vrot.slane %v3660_v6, %v3655_v5 }
 0x125   :  { %2443 = vmatprep.subr.bf16.mxu0 %v3362_v10 }
 0x126   :  { %1999 = vmatpush1.bf16.msra.mxu1 %v3264_v11 }
 0x127   :  { %2000 = vmatprep.subr.bf16.mxu1 %v3269_v13 }
 0x128   :  { %2444 = vmatpush1.bf16.msra.mxu0 %v3360_v14 }
 0x129   :  { %2445 = vmatprep.subr.bf16.mxu0 %v3365_v16 }
 0x12a   :  { %2001 = vmatpush1.bf16.msra.mxu1 %v3267_v17 }
 0x12b   :  { %2002 = vmatprep.subr.bf16.mxu1 %v3272_v18 }
 0x12c   :  { %2446 = vmatpush1.bf16.msra.mxu0 %v3363_v19 }
 0x12d   :  { %2447 = vmatprep.subr.bf16.mxu0 %v3368_v38  ;;  %v3381_v38 = vld [vmem:[#allocation8 + $0x120] ss:$8 sps:$4 sm:$0xff]  }
 0x12e   :  { %2003 = vmatpush1.bf16.msra.mxu1 %v3270_v20 }
 0x12f   :  { %2004 = vmatprep.subr.bf16.mxu1 %v3275_v21 }
 0x132   :  { %2005 = vmatpush1.bf16.msra.mxu1 %v3273_v22 }
 0x133   :  { %2006 = vmatprep.subr.bf16.mxu1 %v3278_v23 }
 0x136   :  { %2007 = vmatpush1.bf16.msra.mxu1 %v3276_v25 }
 0x137   :  { %2019 = vmatprep.subr.bf16.mxu1 %v3281_v26 }
 0x139   :  { %2009 = vmatmul.mubr.bf16.vlgmr.msra.gmra.mrb[4].mxu1 %v3630_v24  ;;  %v3294_v24 = vld [vmem:[#allocation6 + $0x6a8] ss:$16 sps:$4 sm:$0xff]  }
 0x13a   :  { %2020 = vmatpush1.bf16.msra.mxu1 %v3279_v27  ;;  %2051 = vmatprep.mubr.bf16.mxu1 %v3634_v33  ;;  %v3366_v33 = vld [vmem:[#allocation8 + $0xd0] ss:$8 sps:$4 sm:$0xff]  }
 0x13b   :  { %2021 = vmatprep.subr.bf16.mxu1 %v3284_v28  ;;  %2448 = vmatpush1.bf16.msra.mxu0 %v3366_v33  ;;  %v3384_v33 = vld [vmem:[#allocation8 + $0x130] ss:$8 sps:$4 sm:$0xff]  }
 0x13c   :  { %2449 = vmatprep.subr.bf16.mxu0 %v3371_v42  ;;  %v3395_v42 = vld [vmem:[#allocation8 + $0x164] ss:$8 sps:$4 sm:$0xff]  }
 0x13e   :  { %2022 = vmatpush1.bf16.msra.mxu1 %v3282_v29 }
 0x13f   :  { %2023 = vmatprep.subr.bf16.mxu1 %v3287_v30  ;;  %2450 = vmatpush1.bf16.msra.mxu0 %v3369_v45  ;;  %v3396_v45 = vld [vmem:[#allocation8 + $0x170] ss:$8 sps:$4 sm:$0xff]  }
 0x140   :  { %2451 = vmatprep.subr.bf16.mxu0 %v3374_v47  ;;  %v3399_v47 = vld [vmem:[#allocation8 + $0x180] ss:$8 sps:$4 sm:$0xff]  }
 0x142   :  { %2024 = vmatpush1.bf16.msra.mxu1 %v3285_v32 }
 0x143   :  { %2025 = vmatprep.subr.bf16.mxu1 %v3290_v34  ;;  %2452 = vmatpush1.bf16.msra.mxu0 %v3372_v49  ;;  %v3402_v49 = vld [vmem:[#allocation8 + $0x190] ss:$8 sps:$4 sm:$0xff]  }
 0x144   :  { %2464 = vmatprep.subr.bf16.mxu0 %v3377_v52  ;;  %v3410_v52 = vld [vmem:[#allocation8 + $0x1b4] ss:$8 sps:$4 sm:$0xff]  }
 0x146   :  { %2026 = vmatpush1.bf16.msra.mxu1 %v3288_v35 }
 0x147   :  { %2027 = vmatprep.subr.bf16.mxu1 %v3293_v12  ;;  %v3375_v12 = vld [vmem:[#allocation8 + $0x100] ss:$8 sps:$4 sm:$0xff]  }
 0x14a   :  { %2028 = vmatpush1.bf16.msra.mxu1 %v3291_v36  ;;  %v3380_v36 = vld [vmem:[#allocation8 + $0x114] ss:$8 sps:$4 sm:$0xff]  }
 0x14b   :  { %2029 = vmatprep.subr.bf16.mxu1 %v3296_v37  ;;  %v3378_v37 = vld [vmem:[#allocation8 + $0x110] ss:$8 sps:$4 sm:$0xff]  }
 0x14c   :  { %v3645_v40 = vpop.f32.mrb[0].mxu1 }
 0x14d   :  { %v3647_v41 = vpop.f32.mrb[1].mxu1  ;;  %v1753_v9 = vadd.f32 %v3645_v40, %v421_v8  ;;  %v3389_v40 = vld [vmem:[#allocation8 + $0x144] ss:$8 sps:$4 sm:$0xff]  }
 0x14e   :  { %v3649_v55 = vpop.f32.mrb[2].mxu1  ;;  %2030 = vmatpush1.bf16.msra.mxu1 %v3294_v24  ;;  %v3383_v24 = vld [vmem:[#allocation8 + $0x124] ss:$8 sps:$4 sm:$0xff]  }
 0x14f   :  { %v1758_v43 = vpop.f32.mrb[3].mxu1  ;;  %2031 = vmatprep.subr.bf16.mxu1 %v3299_v39  ;;  %v1757_v13 = vadd.f32 %v3649_v55, %v421_v8  ;;  %v3386_v39 = vld [vmem:[#allocation8 + $0x134] ss:$8 sps:$4 sm:$0xff]  }
 0x150   :  { %v3392_v55 = vld [vmem:[#allocation8 + $0x154] ss:$8 sps:$4 sm:$0xff]  }
 0x152   :  { %2032 = vmatpush1.bf16.msra.mxu1 %v3297_v15  ;;  %v3390_v15 = vld [vmem:[#allocation8 + $0x150] ss:$8 sps:$4 sm:$0xff]  }
 0x153   :  { %2033 = vmatprep.subr.bf16.mxu1 %v3302_v44  ;;  %v3398_v44 = vld [vmem:[#allocation8 + $0x174] ss:$8 sps:$4 sm:$0xff]  }
 0x156   :  { %2034 = vmatpush1.bf16.msra.mxu1 %v3300_v46  ;;  %v3401_v46 = vld [vmem:[#allocation8 + $0x184] ss:$8 sps:$4 sm:$0xff]  }
 0x157   :  { %2035 = vmatprep.subr.bf16.mxu1 %v3305_v48  ;;  %v3404_v48 = vld [vmem:[#allocation8 + $0x194] ss:$8 sps:$4 sm:$0xff]  }
 0x15a   :  { %2036 = vmatpush1.bf16.msra.mxu1 %v3303_v50  ;;  %v3407_v50 = vld [vmem:[#allocation8 + $0x1a4] ss:$8 sps:$4 sm:$0xff]  }
 0x15b   :  { %2037 = vmatprep.subr.bf16.mxu1 %v3308_v51  ;;  %v3405_v51 = vld [vmem:[#allocation8 + $0x1a0] ss:$8 sps:$4 sm:$0xff]  }
 0x15e   :  { %2038 = vmatpush1.bf16.msra.mxu1 %v3306_v53  ;;  %v3408_v53 = vld [vmem:[#allocation8 + $0x1b0] ss:$8 sps:$4 sm:$0xff]  }
 0x15f   :  { %2039 = vmatprep.subr.bf16.mxu1 %v3311_v54  ;;  %v3413_v54 = vld [vmem:[#allocation8 + $0x1c4] ss:$8 sps:$4 sm:$0xff]  }
 0x162   :  { %2040 = vmatpush1.bf16.msra.mxu1 %v3309_v56  ;;  %v3411_v56 = vld [vmem:[#allocation8 + $0x1c0] ss:$8 sps:$4 sm:$0xff]  }
 0x163   :  { %2041 = vmatprep.subr.bf16.mxu1 %v3314_v57  ;;  %v3416_v57 = vld [vmem:[#allocation8 + $0x1d4] ss:$8 sps:$4 sm:$0xff]  }
 0x166   :  { %2042 = vmatpush1.bf16.msra.mxu1 %v3312_v58  ;;  %v3414_v58 = vld [vmem:[#allocation8 + $0x1d0] ss:$8 sps:$4 sm:$0xff]  }
 0x167   :  { %2043 = vmatprep.subr.bf16.mxu1 %v3317_v59  ;;  %v3419_v59 = vld [vmem:[#allocation8 + $0x1e4] ss:$8 sps:$4 sm:$0xff]  }
 0x16a   :  { %2044 = vmatpush1.bf16.msra.mxu1 %v3315_v60  ;;  %v3417_v60 = vld [vmem:[#allocation8 + $0x1e0] ss:$8 sps:$4 sm:$0xff]  }
 0x16b   :  { %2045 = vmatprep.subr.bf16.mxu1 %v3320_v61  ;;  %v3422_v61 = vld [vmem:[#allocation8 + $0x1f4] ss:$8 sps:$4 sm:$0xff]  }
 0x16e   :  { %2046 = vmatpush1.bf16.msra.mxu1 %v3318_v62  ;;  %v3420_v62 = vld [vmem:[#allocation8 + $0x1f0] ss:$8 sps:$4 sm:$0xff]  }
 0x16f   :  { %2047 = vmatprep.subr.bf16.mxu1 %v3323_v63  ;;  %v428_v63 = vsub.s32 2, %v3652_v4 }
 0x172   :  { %2048 = vmatpush1.bf16.msra.mxu1 %v3321_v0  ;;  %v432_v0 = vsub.s32 3, %v3652_v4 }
 0x173   :  { %2049 = vmatprep.subr.bf16.mxu1 %v3326_v1  ;;  %v429_v1 = vrot.slane %v3660_v6, %v428_v63 }
 0x176   :  { %2050 = vmatpush1.bf16.msra.mxu1 %v3324_v2  ;;  %v433_v2 = vrot.slane %v3660_v6, %v432_v0 }
 0x179   :  { %2052 = vmatmul.mubr.bf16.vlgmr.msra.gmra.mrb[4].mxu1 %v3638_v31  ;;  %v425_v31 = vrot.slane %v3660_v6, %v3663_v7 }
 0x17b   :  { %v1755_v10 = vadd.f32 %v3647_v41, %v425_v31  ;;  %v1759_v17 = vadd.f32 %v1758_v43, %v425_v31  ;;  %v3387_v41 = vld [vmem:[#allocation8 + $0x140] ss:$8 sps:$4 sm:$0xff]  }
 0x17c   :  { %v3393_v43 = vld [vmem:[#allocation8 + $0x160] ss:$8 sps:$4 sm:$0xff]  }
 0x1cd   :  { %v1881_v11 = vpop.f32.mrb[0].mxu0 }
 0x1ce   :  { %v2894_v14 = vadd.f32 %v1881_v11, %v1753_v9  ;;  %v1883_v16 = vpop.f32.mrb[1].mxu0 }
 0x1cf   :  { %v2896_v18 = vadd.f32 %v1883_v16, %v1755_v10  ;;  %v1885_v19 = vpop.f32.mrb[2].mxu0 }
 0x1d0   :  { %v2070_v20 = vmul.f32 0.2, %v2894_v14  ;;  %v2898_v21 = vadd.f32 %v1885_v19, %v1757_v13  ;;  %v1887_v22 = vpop.f32.mrb[3].mxu0  ;;  %vm2062_vm0 = vcmp.gt.f32.partialorder %v2894_v14, 0.0 }
 0x1d1   :  { %v2071_v23 = vmul.f32 0.2, %v2896_v18  ;;  %v2900_v25 = vadd.f32 %v1887_v22, %v1759_v17  ;;  %vm2063_vm1 = vcmp.gt.f32.partialorder %v2896_v18, 0.0 }
 0x1d2   :  { %vm2066_vm2 = vcmp.gt.f32.partialorder %v2898_v21, 0.0  ;;  %v2074_v26 = vmul.f32 0.2, %v2898_v21  ;;  %v2078_v28 = vsel %vm2062_vm0, %v2894_v14, %v2070_v20 }
 0x1d3   :  { %vm2067_vm3 = vcmp.gt.f32.partialorder %v2900_v25, 0.0  ;;  %v2075_v27 = vmul.f32 0.2, %v2900_v25  ;;  %v2079_v32 = vsel %vm2063_vm1, %v2896_v18, %v2071_v23 }
 0x1d4   :  { %v2082_v29 = vsel %vm2066_vm2, %v2898_v21, %v2074_v26 }
 0x1d5   :  { %v2086_v30 = vpack.c.bf16 %v2082_v29, %v2078_v28  ;;  %v2083_v34 = vsel %vm2067_vm3, %v2900_v25, %v2075_v27  ;;  %v414_v25 = vld [vmem:[%s3708_s4] sm:$0x3] }
 0x1d6   :  { %v2087_v35 = vpack.c.bf16 %v2083_v34, %v2079_v32  ;;  %v2094_v26 = vrot.slane %v414_v25, %v3655_v5  ;;  %v2098_v27 = vrot.slane %v414_v25, %v3663_v7  ;;  %v415_v28 = vld [vmem:[%s3709_s5] sm:$0x3] }
 0x1d8   :  { %2453 = vmatprep.mubr.bf16.mxu0 %v2087_v35 }
 0x1d9   :  { %2454 = vmatmul.mubr.bf16.vlgmr.msra.gmra.mrb[4].mxu0 %v2086_v30 }
 0x1da   :  { %2465 = vmatpush1.bf16.msra.mxu0 %v3375_v12  ;;  %v2523_v12 = vrot.slane %v415_v28, %v3655_v5 }
 0x1db   :  { %2466 = vmatprep.subr.bf16.mxu0 %v3380_v36 }
 0x1de   :  { %2467 = vmatpush1.bf16.msra.mxu0 %v3378_v37 }
 0x1df   :  { %2468 = vmatprep.subr.bf16.mxu0 %v3383_v24 }
 0x1e2   :  { %2469 = vmatpush1.bf16.msra.mxu0 %v3381_v38  ;;  %v2527_v38 = vrot.slane %v415_v28, %v3663_v7  ;;  %v2540_v7 = vstv %s3710_s6  ;;  %s3497_s6 = scalar_lea.vmem %s2561_s23, 256 }
 0x1e3   :  { %2470 = vmatprep.subr.bf16.mxu0 %v3386_v39  ;;  %p3498_p10 = scmp.ne.s32.totalorder %s2561_s23, %s3497_s6  ;;  %p3503_p12 = scmp.lt.s32.totalorder %s3497_s6, %s3497_s6 }
 0x1e5   :  { %p3504_p13 = por %p3503_p12, %p3502_p11 }
 0x1e6   :  { %2471 = vmatpush1.bf16.msra.mxu0 %v3384_v33 }
 0x1e7   :  { %2472 = vmatprep.subr.bf16.mxu0 %v3389_v40  ;;  %p3505_p0 = pnand %p3504_p13, %p3498_p10 }
 0x1ea   :  { %2473 = vmatpush1.bf16.msra.mxu0 %v3387_v41 }
 0x1eb   :  { %2474 = vmatprep.subr.bf16.mxu0 %v3392_v55 }
 0x1ee   :  { %2475 = vmatpush1.bf16.msra.mxu0 %v3390_v15 }
 0x1ef   :  { %2476 = vmatprep.subr.bf16.mxu0 %v3395_v42 }
 0x1f2   :  { %2477 = vmatpush1.bf16.msra.mxu0 %v3393_v43 }
 0x1f3   :  { %2478 = vmatprep.subr.bf16.mxu0 %v3398_v44 }
 0x1f6   :  { %2479 = vmatpush1.bf16.msra.mxu0 %v3396_v45 }
 0x1f7   :  { %2480 = vmatprep.subr.bf16.mxu0 %v3401_v46 }
 0x1fa   :  { %2481 = vmatpush1.bf16.msra.mxu0 %v3399_v47 }
 0x1fb   :  { %2482 = vmatprep.subr.bf16.mxu0 %v3404_v48 }
 0x1fe   :  { %2483 = vmatpush1.bf16.msra.mxu0 %v3402_v49 }
 0x1ff   :  { %2484 = vmatprep.subr.bf16.mxu0 %v3407_v50 }
 0x202   :  { %2485 = vmatpush1.bf16.msra.mxu0 %v3405_v51 }
 0x203   :  { %2486 = vmatprep.subr.bf16.mxu0 %v3410_v52 }
 0x206   :  { %2487 = vmatpush1.bf16.msra.mxu0 %v3408_v53 }
 0x207   :  { %2488 = vmatprep.subr.bf16.mxu0 %v3413_v54 }
 0x20a   :  { %2489 = vmatpush1.bf16.msra.mxu0 %v3411_v56 }
 0x20b   :  { %2490 = vmatprep.subr.bf16.mxu0 %v3416_v57 }
 0x20e   :  { %2491 = vmatpush1.bf16.msra.mxu0 %v3414_v58 }
 0x20f   :  { %2492 = vmatprep.subr.bf16.mxu0 %v3419_v59 }
 0x212   :  { %2493 = vmatpush1.bf16.msra.mxu0 %v3417_v60 }
 0x213   :  { %2494 = vmatprep.subr.bf16.mxu0 %v3422_v61 }
 0x216   :  { %2495 = vmatpush1.bf16.msra.mxu0 %v3420_v62 }
 0x24c   :  { %v2053_v3 = vpop.f32.mrb[4].mxu1 }
 0x24d   :  { %v2901_v8 = vadd.f32 %v2053_v3, %v429_v1  ;;  %v2055_v31 = vpop.f32.mrb[5].mxu1 }
 0x24e   :  { %v2902_v9 = vadd.f32 %v2055_v31, %v433_v2  ;;  %v2057_v10 = vpop.f32.mrb[6].mxu1 }
 0x24f   :  { %v2072_v11 = vmul.f32 0.2, %v2901_v8  ;;  %v2903_v13 = vadd.f32 %v2057_v10, %v429_v1  ;;  %v2059_v14 = vpop.f32.mrb[7].mxu1  ;;  %vm2064_vm4 = vcmp.gt.f32.partialorder %v2901_v8, 0.0 }
 0x250   :  { %v2073_v16 = vmul.f32 0.2, %v2902_v9  ;;  %v2904_v17 = vadd.f32 %v2059_v14, %v433_v2  ;;  %vm2065_vm5 = vcmp.gt.f32.partialorder %v2902_v9, 0.0 }
 0x251   :  { %vm2068_vm6 = vcmp.gt.f32.partialorder %v2903_v13, 0.0  ;;  %v2076_v18 = vmul.f32 0.2, %v2903_v13  ;;  %v2080_v19 = vsel %vm2064_vm4, %v2901_v8, %v2072_v11 }
 0x252   :  { %vm2069_vm7 = vcmp.gt.f32.partialorder %v2904_v17, 0.0  ;;  %v2077_v4 = vmul.f32 0.2, %v2904_v17  ;;  %v2081_v6 = vsel %vm2065_vm5, %v2902_v9, %v2073_v16 }
 0x253   :  { %v2084_v20 = vsel %vm2068_vm6, %v2903_v13, %v2076_v18 }
 0x254   :  { %v2088_v21 = vpack.c.bf16 %v2084_v20, %v2080_v19  ;;  %v2085_v22 = vsel %vm2069_vm7, %v2904_v17, %v2077_v4 }
 0x255   :  { %v2089_v23 = vpack.c.bf16 %v2085_v22, %v2081_v6 }
 0x257   :  { %2496 = vmatprep.mubr.bf16.mxu0 %v2089_v23 }
 0x258   :  { %2497 = vmatmul.mubr.bf16.vlgmr.msra.gmra.mrb[4].mxu0 %v2088_v21 }
 0x32b   :  { %v2498_v29 = vpop.f32.mrb[4].mxu0 }
 0x32c   :  { %v2905_v30 = vadd.f32 %v2498_v29, %v2094_v26  ;;  %v2500_v32 = vpop.f32.mrb[5].mxu0 }
 0x32d   :  { %v2906_v34 = vadd.f32 %v2500_v32, %v2098_v27  ;;  %v2502_v35 = vpop.f32.mrb[6].mxu0 }
 0x32e   :  { %vm2507_vm8 = vcmp.gt.f32.partialorder %v2905_v30, 0.0  ;;  %v2511_v36 = vmul.f32 0.2, %v2905_v30  ;;  %v2907_v37 = vadd.f32 %v2502_v35, %v2094_v26  ;;  %v2504_v24 = vpop.f32.mrb[7].mxu0 }
 0x32f   :  { %vm2508_vm9 = vcmp.gt.f32.partialorder %v2906_v34, 0.0  ;;  %v2512_v39 = vmul.f32 0.2, %v2906_v34  ;;  %v2908_v33 = vadd.f32 %v2504_v24, %v2098_v27 }
 0x330   :  { %vm2509_vm10 = vcmp.gt.f32.partialorder %v2907_v37, 0.0  ;;  %v2513_v40 = vmul.f32 0.2, %v2907_v37  ;;  %v2515_v41 = vsel %vm2507_vm8, %v2905_v30, %v2511_v36 }
 0x331   :  { %vm2510_vm11 = vcmp.gt.f32.partialorder %v2908_v33, 0.0  ;;  %v2514_v55 = vmul.f32 0.2, %v2908_v33  ;;  %v2516_v15 = vsel %vm2508_vm9, %v2906_v34, %v2512_v39  ;;  %v2530_v42 = vmul.f32 %v2523_v12, %v2515_v41 }
 0x332   :  { %v2531_v43 = vmul.f32 %v2527_v38, %v2516_v15  ;;  %v2517_v44 = vsel %vm2509_vm10, %v2907_v37, %v2513_v40 }
 0x333   :  { %v2518_v45 = vsel %vm2510_vm11, %v2908_v33, %v2514_v55  ;;  %v2532_v5 = vmul.f32 %v2523_v12, %v2517_v44 }
 0x334   :  { %v2534_v46 = vadd.f32 %v2531_v43, %v2530_v42  ;;  %v2533_v47 = vmul.f32 %v2527_v38, %v2518_v45 }
 0x336   :  { %2535 = vadd.xlane.f32.xlu0 %v2534_v46  ;;  %v2537_v48 = vadd.f32 %v2533_v47, %v2532_v5 }
 0x33a   :  { %2538 = vadd.xlane.f32.xlu0 %v2537_v48 }
 0x3c3   :  { %v2536_v49 = vpop.xlane.xlu0 %2535 }
 0x3c4   :  { %v2541_v50 = vadd.f32 %v2540_v7, %v2536_v49 }
 0x3c6   :  { %v2543_v51 = vsub.f32 0.0, %v2541_v50 }
 0x3c7   :  { %v2539_v52 = vpop.xlane.xlu0 %2538 }
 0x3c8   :  { %v2545_v53 = vmul.f32 1.442695, %v2543_v51  ;;  %v2542_v54 = vadd.f32 %v2540_v7, %v2539_v52 }
 0x3ca   :  { %3423 = vpow2.f32 %v2545_v53  ;;  %v2544_v56 = vsub.f32 0.0, %v2542_v54 }
 0x3cc   :  { %v2547_v57 = vmul.f32 1.442695, %v2544_v56 }
 0x3ce   :  { %3425 = vpow2.f32 %v2547_v57 }
 0x3d4   :  { %v3424_v58 = vpop.eup %3423 }
 0x3d5   :  { %v2549_v59 = vadd.f32 1.0, %v3424_v58 }
 0x3d7   :  { %3427 = vrcp.f32 %v2549_v59 }
 0x3d8   :  { %v3426_v60 = vpop.eup %3425 }
 0x3d9   :  { %v2550_v61 = vadd.f32 1.0, %v3426_v60 }
 0x3db   :  { %3429 = vrcp.f32 %v2550_v61 }
 0x3e1   :  { %v3428_v62 = vpop.eup %3427 }
 0x3e2   :  { %2553 = vst [vmem:[#allocation9] sm:$0xff] %v3428_v62 }
 0x3e5   :  { %v3430_v63 = vpop.eup %3429 }
 0x3e6   :  { %2554 = vst [vmem:[#allocation9 + $0x8] sm:$0xff] %v3430_v63 }
 0x3e7   :  { %3508 = shalt.err (!%p3505_p0)
}
 0x3e8   :  { %s3509_s25 = scalar_lea.hbm %s3711_s7, 256 }
 0x3e9   :  { %p3510_p1 = scmp.ne.s32.totalorder %s3711_s7, %s3509_s25  ;;  %p3513_p2 = scmp.lt.u32.totalorder %s3509_s25, %s3711_s7 }
 0x3eb   :  { %p3515_p3 = pnand %p3513_p2, %p3510_p1 }
 0x3ed   :  { %3518 = shalt.err (!%p3515_p3)
}
 0x3ee   :  { %2566 = dma.vmem_to_hbm [thread:$0]  %s2561_s23, 256, %s3711_s7, [#allocation5], %s3532_s0, %s3532_s0, %s3533_s15  }
 0x3ef   :  { %3523 = dma.done.wait [#allocation5], 256  }
 0x3f0   :  { %3524 = vsyncadd [#allocation5], 4294967040 }
 0x3f1   :  { %2570 = vsyncpa [#allocation4], 1 }
 0x3f2   :  { %2571 = vsyncpa [#allocation7], 1 }
 0x3f3   :  { %2572 = vsyncpa [#allocation5], 1 }

</bundles_post_ra>
